<compile_context>
chip_gen: v6e
topology: v6e:2x2x1
jax: 0.10.0
libtpu: 0.0.40
codegen_flags: <defaults>
</compile_context>

<pallas_src>
import functools

import jax
import jax.numpy as jnp
from jax import lax
from jax.experimental import pallas as pl
from jax.experimental.pallas import tpu as pltpu


# ---------------------------------------------------------------------------
# Fused RA_Net kernel (one grid step == one image)
# ---------------------------------------------------------------------------
def _lane_shift(x, s, length):
    """out[:, p] = x[:, (p + s) % length] (static circular lane shift)."""
    s = s % length
    if s == 0:
        return x
    return jnp.concatenate([x[:, s:], x[:, :s]], axis=1)


def ra_net_kernel(img_ref, mask_ref, wc_ref, bc_ref, wa_ref, ba_ref,
                  wd_ref, bd_ref, w0_ref, b0_ref, w1_ref, b1_ref,
                  w2_ref, b2_ref, cls_ref, p_ref, *, wp, hw):
    f32 = jnp.float32
    bf16 = jnp.bfloat16
    lp = img_ref.shape[1]                                    # Hp*Wp (padded plane)

    # Padded image plane, bf16 in HBM (halved DMA), f32 for the shifted views.
    x32 = img_ref[...].astype(f32)                           # (C_in, Lp)

    # Backbone conv3x3 (+bias, ReLU) as 9 accumulating lane-shifted matmuls.
    # feat is computed over the padded plane; padded positions are masked at pooling.
    feat = None
    for k in range(9):
        dy, dx = k // 3, k % 3
        shift = (dy - 1) * wp + (dx - 1)
        xk = _lane_shift(x32, shift, lp).astype(bf16)        # (C_in, Lp)
        term = lax.dot_general(wc_ref[k], xk, (((1,), (0,)), ((), ())),
                               preferred_element_type=f32)   # (C_out, Lp)
        feat = term if feat is None else feat + term
    feat = jnp.maximum(feat + bc_ref[...], 0.0)              # (C_out, Lp) f32
    feat16 = feat.astype(bf16)                               # single bf16 copy, reused

    # Attention maps: 1x1 conv + sigmoid.
    attn = lax.dot_general(wa_ref[...], feat16, (((1,), (0,)), ((), ())),
                           preferred_element_type=f32) + ba_ref[...]
    attn = jax.nn.sigmoid(attn)                              # (M, Lp)

    # Pooling in one contraction: row 0 = interior mask (plain GAP),
    # rows 1..M = interior-masked attention maps.
    mask = mask_ref[...]                                     # (1, Lp), 1 on interior
    lhs = jnp.concatenate([mask, attn * mask], axis=0).astype(bf16)   # (M+1, Lp)
    vx = lax.dot_general(lhs, feat16, (((1,), (1,)), ((), ())),
                         preferred_element_type=f32) * (1.0 / hw)     # (M+1, C_out)
    vx16 = vx.astype(bf16)

    # Diversity head: Linear (lane-padded to 128, -1e30 bias pad) + softmax.
    d = jnp.dot(vx16, wd_ref[...], preferred_element_type=f32) + bd_ref[...]
    d = d - jnp.max(d, axis=-1, keepdims=True)
    e = jnp.exp(d)
    p_ref[...] = e * pl.reciprocal(jnp.sum(e, axis=-1, keepdims=True), approx=True)

    # Classifier (eval-mode BN folded into W/b); fc2 lane-padded -> dense store.
    h = jnp.dot(vx16, w0_ref[...], preferred_element_type=f32) + b0_ref[...]
    h = jnp.maximum(h, 0.0).astype(bf16)
    h = jnp.dot(h, w1_ref[...], preferred_element_type=f32) + b1_ref[...]
    h = jnp.maximum(h, 0.0).astype(bf16)
    cls_ref[...] = jnp.dot(h, w2_ref[...], preferred_element_type=f32) + b2_ref[...]


# ---------------------------------------------------------------------------
# Host wrapper (layout prep + single pallas_call, grid over batch)
# ---------------------------------------------------------------------------
@jax.jit
def ra_net_forward(image, params):
    """Returns (classifier(GAP(x)), [P1..PM], [y1..yM]) like RA_Net.forward."""
    N, C_in, H, W = image.shape
    C_out = params["conv_w"].shape[0]
    M = params["attn_w"].shape[0]
    Hp, Wp = H + 2, W + 2
    Lp = Hp * Wp
    HW = H * W
    LANES = 128

    # Zero-padded image, spatially flattened, bf16 in HBM.
    xp = jnp.pad(image, ((0, 0), (0, 0), (1, 1), (1, 1)))
    x_flat = xp.reshape(N, C_in, Lp).astype(jnp.bfloat16)

    # Interior-position mask (identical for every image): doubles as the GAP row.
    row_ok = (jnp.arange(Hp) >= 1) & (jnp.arange(Hp) <= H)
    col_ok = (jnp.arange(Wp) >= 1) & (jnp.arange(Wp) <= W)
    mask = (row_ok[:, None] & col_ok[None, :]).astype(jnp.float32).reshape(1, Lp)

    # Conv weights grouped by kernel offset k = dy*3 + dx.
    wc = jnp.transpose(params["conv_w"], (2, 3, 0, 1)).reshape(9, C_out, C_in)
    wc = wc.astype(jnp.bfloat16)
    bc = params["conv_b"][:, None]                                   # (C_out, 1)

    wa = params["attn_w"].reshape(M, C_out).astype(jnp.bfloat16)
    ba = params["attn_b"][:, None]                                   # (M, 1)

    # Diversity Linear padded to 128 lanes; -1e30 bias pad -> padded softmax cols = 0.
    wd = jnp.zeros((C_out, LANES), jnp.float32).at[:, :M].set(params["div_w"].T)
    wd = wd.astype(jnp.bfloat16)
    bd = jnp.full((1, LANES), -1e30, jnp.float32).at[0, :M].set(params["div_b"])

    # Classifier with eval-mode BatchNorm1d folded into the Linears (exact fold).
    eps = 1e-5
    s0 = params["bn0_gamma"] / jnp.sqrt(params["bn0_var"] + eps)
    t0 = params["bn0_beta"] - params["bn0_mean"] * s0
    s1 = params["bn1_gamma"] / jnp.sqrt(params["bn1_var"] + eps)
    t1 = params["bn1_beta"] - params["bn1_mean"] * s1
    w0 = (params["fc0_w"].T * s0[None, :]).astype(jnp.bfloat16)      # (C_out, 512)
    b0 = (params["fc0_b"] * s0 + t0)[None, :]
    w1 = (params["fc1_w"].T * s1[None, :]).astype(jnp.bfloat16)      # (512, 128)
    b1 = (params["fc1_b"] * s1 + t1)[None, :]
    w2 = jnp.zeros((128, LANES), jnp.float32).at[:, :1].set(params["fc2_w"].T)
    w2 = w2.astype(jnp.bfloat16)                                     # (128, 128)
    b2 = jnp.zeros((1, LANES), jnp.float32).at[0, :1].set(params["fc2_b"])

    const2 = lambda n: (0, 0)
    const3 = lambda n: (0, 0, 0)
    in_specs = [
        pl.BlockSpec((None, C_in, Lp), lambda n: (n, 0, 0)),   # image: advances with grid
        pl.BlockSpec((1, Lp), const2),                         # interior mask (resident)
        pl.BlockSpec((9, C_out, C_in), const3),                # conv W (resident)
        pl.BlockSpec((C_out, 1), const2),                      # conv b
        pl.BlockSpec((M, C_out), const2),                      # attn W
        pl.BlockSpec((M, 1), const2),                          # attn b
        pl.BlockSpec((C_out, LANES), const2),                  # diversity W (padded)
        pl.BlockSpec((1, LANES), const2),                      # diversity b (padded)
        pl.BlockSpec((C_out, 512), const2),                    # fc0 W (BN folded)
        pl.BlockSpec((1, 512), const2),                        # fc0 b
        pl.BlockSpec((512, 128), const2),                      # fc1 W (BN folded)
        pl.BlockSpec((1, 128), const2),                        # fc1 b
        pl.BlockSpec((128, LANES), const2),                    # fc2 W (padded)
        pl.BlockSpec((1, LANES), const2),                      # fc2 b (padded)
    ]
    out_specs = (
        pl.BlockSpec((None, M + 1, LANES), lambda n: (n, 0, 0)),   # classifier rows
        pl.BlockSpec((None, M + 1, LANES), lambda n: (n, 0, 0)),   # diversity rows
    )
    out_shape = (
        jax.ShapeDtypeStruct((N, M + 1, LANES), jnp.float32),
        jax.ShapeDtypeStruct((N, M + 1, LANES), jnp.float32),
    )

    flops = int(
        2 * 9 * C_in * C_out * N * Lp                 # backbone conv
        + 2 * C_out * M * N * Lp                      # 1x1 attention conv
        + 2 * (M + 1) * C_out * N * Lp                # pooled contraction
        + 2 * N * (M + 1) * (C_out * 512 + 512 * 128 + 128 * LANES + C_out * LANES))
    transcendentals = int(N * Lp * M + N * (M + 1) * LANES)
    bytes_accessed = int(
        x_flat.size * 2 + mask.size * 4
        + wc.size * 2 + bc.size * 4 + wa.size * 2 + ba.size * 4
        + wd.size * 2 + bd.size * 4 + w0.size * 2 + b0.size * 4
        + w1.size * 2 + b1.size * 4 + w2.size * 2 + b2.size * 4
        + 2 * N * (M + 1) * LANES * 4)

    cls_all, p_all = pl.pallas_call(
        functools.partial(ra_net_kernel, wp=Wp, hw=HW),
        grid=(N,),
        in_specs=in_specs,
        out_specs=out_specs,
        out_shape=out_shape,
        compiler_params=pltpu.CompilerParams(
            # Batch axis is fully independent -> shards across v7x's 2 TensorCores;
            # no-op on single-TC v5e/v6e.
            dimension_semantics=("parallel",),
            vmem_limit_bytes=32 * 1024 * 1024,
        ),
        cost_estimate=pl.CostEstimate(flops=flops,
                                      transcendentals=transcendentals,
                                      bytes_accessed=bytes_accessed),
    )(x_flat, mask, wc, bc, wa, ba, wd, bd, w0, b0, w1, b1, w2, b2)

    cls_x = cls_all[:, 0, 0:1]                                    # classifier(GAP(x))
    P_list = [p_all[:, i + 1, :M] for i in range(M)]              # diversity(v_i)
    y_list = [cls_all[:, i + 1, 0:1] for i in range(M)]           # classifier(v_i)
    return cls_x, P_list, y_list


# ---------------------------------------------------------------------------
# Pure-JAX f32 reference (verification only)
# ---------------------------------------------------------------------------
def ra_net_reference(image, params):
    eps = 1e-5
    feat = lax.conv_general_dilated(
        image, params["conv_w"], (1, 1), "SAME",
        dimension_numbers=("NCHW", "OIHW", "NCHW"))
    feat = jnp.maximum(feat + params["conv_b"][None, :, None, None], 0.0)
    x = jnp.mean(feat, axis=(2, 3))

    attn = lax.conv_general_dilated(
        feat, params["attn_w"], (1, 1), "SAME",
        dimension_numbers=("NCHW", "OIHW", "NCHW"))
    attn = jax.nn.sigmoid(attn + params["attn_b"][None, :, None, None])

    def classifier(z):
        h = z @ params["fc0_w"].T + params["fc0_b"]
        h = (h - params["bn0_mean"]) / jnp.sqrt(params["bn0_var"] + eps)
        h = jnp.maximum(h * params["bn0_gamma"] + params["bn0_beta"], 0.0)
        h = h @ params["fc1_w"].T + params["fc1_b"]
        h = (h - params["bn1_mean"]) / jnp.sqrt(params["bn1_var"] + eps)
        h = jnp.maximum(h * params["bn1_gamma"] + params["bn1_beta"], 0.0)
        return h @ params["fc2_w"].T + params["fc2_b"]

    def diversity(z):
        return jax.nn.softmax(z @ params["div_w"].T + params["div_b"], axis=-1)

    M = params["attn_w"].shape[0]
    vs = [jnp.mean(attn[:, i:i + 1] * feat, axis=(2, 3)) for i in range(M)]
    return classifier(x), [diversity(v) for v in vs], [classifier(v) for v in vs]


# ---------------------------------------------------------------------------
# Deterministic parameters + run
# ---------------------------------------------------------------------------
def init_params(key, c_in, out_channels, m):
    ks = jax.random.split(key, 20)
    n01 = lambda k, shape: jax.random.normal(k, shape, jnp.float32)
    return {
        "conv_w": 0.1 * n01(ks[0], (out_channels, c_in, 3, 3)),
        "conv_b": 0.1 * n01(ks[1], (out_channels,)),
        "attn_w": 0.1 * n01(ks[2], (m, out_channels, 1, 1)),
        "attn_b": 0.1 * n01(ks[3], (m,)),
        "div_w": 0.1 * n01(ks[4], (m, out_channels)),
        "div_b": 0.1 * n01(ks[5], (m,)),
        "fc0_w": 0.1 * n01(ks[6], (512, out_channels)),
        "fc0_b": 0.05 * n01(ks[7], (512,)),
        "bn0_gamma": 1.0 + 0.1 * n01(ks[8], (512,)),
        "bn0_beta": 0.1 * n01(ks[9], (512,)),
        "bn0_mean": 0.1 * n01(ks[10], (512,)),
        "bn0_var": jnp.abs(1.0 + 0.1 * n01(ks[11], (512,))),
        "fc1_w": 0.05 * n01(ks[12], (128, 512)),
        "fc1_b": 0.05 * n01(ks[13], (128,)),
        "bn1_gamma": 1.0 + 0.1 * n01(ks[14], (128,)),
        "bn1_beta": 0.1 * n01(ks[15], (128,)),
        "bn1_mean": 0.1 * n01(ks[16], (128,)),
        "bn1_var": jnp.abs(1.0 + 0.1 * n01(ks[17], (128,))),
        "fc2_w": 0.1 * n01(ks[18], (1, 128)),
        "fc2_b": 0.1 * n01(ks[19], (1,)),
    }


if __name__ == "__main__":
    N, C_IN, H, W = 2, 4, 16, 16
    OUT_CHANNELS, M = 32, 4          # forward() hardcodes 4 attention branches

    key = jax.random.PRNGKey(0)
    k_img, k_par = jax.random.split(key)
    image = jax.random.normal(k_img, (N, C_IN, H, W), jnp.float32)   # NCHW
    params = init_params(k_par, C_IN, OUT_CHANNELS, M)

    out = jax.block_until_ready(ra_net_forward(image, params))
    ref = jax.block_until_ready(ra_net_reference(image, params))

    cls_x, P_list, y_list = out
    cls_x_r, P_list_r, y_list_r = ref

    tol = dict(rtol=2e-2, atol=2e-2)   # bf16 MXU operands vs f32 reference
    assert cls_x.shape == (N, 1), cls_x.shape
    ok = bool(jnp.allclose(cls_x, cls_x_r, **tol))
    for a, b in zip(P_list, P_list_r):
        assert a.shape == (N, M), a.shape
        ok &= bool(jnp.allclose(a, b, **tol))
    for a, b in zip(y_list, y_list_r):
        assert a.shape == (N, 1), a.shape
        ok &= bool(jnp.allclose(a, b, **tol))
    assert ok, "Pallas RA_Net output mismatch vs f32 reference"
    print("KERNEL_OK")
</pallas_src>

<mosaic_0001>
module attributes {stable_mosaic.version = 11 : i64} {
  func.func @ra_net_kernel(%arg0: i32, %arg1: memref<1x4x324xbf16, #tpu.memory_space<vmem>>, %arg2: memref<1x324xf32, #tpu.memory_space<vmem>>, %arg3: memref<9x32x4xbf16, #tpu.memory_space<vmem>>, %arg4: memref<32x1xf32, #tpu.memory_space<vmem>>, %arg5: memref<4x32xbf16, #tpu.memory_space<vmem>>, %arg6: memref<4x1xf32, #tpu.memory_space<vmem>>, %arg7: memref<32x128xbf16, #tpu.memory_space<vmem>>, %arg8: memref<1x128xf32, #tpu.memory_space<vmem>>, %arg9: memref<32x512xbf16, #tpu.memory_space<vmem>>, %arg10: memref<1x512xf32, #tpu.memory_space<vmem>>, %arg11: memref<512x128xbf16, #tpu.memory_space<vmem>>, %arg12: memref<1x128xf32, #tpu.memory_space<vmem>>, %arg13: memref<128x128xbf16, #tpu.memory_space<vmem>>, %arg14: memref<1x128xf32, #tpu.memory_space<vmem>>, %arg15: memref<1x5x128xf32, #tpu.memory_space<vmem>>, %arg16: memref<1x5x128xf32, #tpu.memory_space<vmem>>) attributes {dimension_semantics = [#tpu.dimension_semantics<parallel>], iteration_bounds = array<i64: 2>, scalar_prefetch = 0 : i64, scratch_operands = 0 : i64, tpu.core_type = #tpu.core_type<tc>, window_params = [{transform_indices = @transform_0, window_bounds = array<i64: 1, 4, 324>}, {pipeline_mode = #tpu.pipeline_mode<synchronous>, transform_indices = @transform_1, window_bounds = array<i64: 1, 324>}, {pipeline_mode = #tpu.pipeline_mode<synchronous>, transform_indices = @transform_2, window_bounds = array<i64: 9, 32, 4>}, {pipeline_mode = #tpu.pipeline_mode<synchronous>, transform_indices = @transform_3, window_bounds = array<i64: 32, 1>}, {pipeline_mode = #tpu.pipeline_mode<synchronous>, transform_indices = @transform_4, window_bounds = array<i64: 4, 32>}, {pipeline_mode = #tpu.pipeline_mode<synchronous>, transform_indices = @transform_5, window_bounds = array<i64: 4, 1>}, {pipeline_mode = #tpu.pipeline_mode<synchronous>, transform_indices = @transform_6, window_bounds = array<i64: 32, 128>}, {pipeline_mode = #tpu.pipeline_mode<synchronous>, transform_indices = @transform_7, window_bounds = array<i64: 1, 128>}, {pipeline_mode = #tpu.pipeline_mode<synchronous>, transform_indices = @transform_8, window_bounds = array<i64: 32, 512>}, {pipeline_mode = #tpu.pipeline_mode<synchronous>, transform_indices = @transform_9, window_bounds = array<i64: 1, 512>}, {pipeline_mode = #tpu.pipeline_mode<synchronous>, transform_indices = @transform_10, window_bounds = array<i64: 512, 128>}, {pipeline_mode = #tpu.pipeline_mode<synchronous>, transform_indices = @transform_11, window_bounds = array<i64: 1, 128>}, {pipeline_mode = #tpu.pipeline_mode<synchronous>, transform_indices = @transform_12, window_bounds = array<i64: 128, 128>}, {pipeline_mode = #tpu.pipeline_mode<synchronous>, transform_indices = @transform_13, window_bounds = array<i64: 1, 128>}, {transform_indices = @transform_14, window_bounds = array<i64: 1, 5, 128>}, {transform_indices = @transform_15, window_bounds = array<i64: 1, 5, 128>}]} {
    %c0 = arith.constant 0 : index
    %c0_0 = arith.constant 0 : index
    %c0_1 = arith.constant 0 : index
    %0 = vector.load %arg1[%c0, %c0_0, %c0_1] : memref<1x4x324xbf16, #tpu.memory_space<vmem>>, vector<1x4x324xbf16>
    %1 = vector.shape_cast %0 : vector<1x4x324xbf16> to vector<4x324xbf16>
    %2 = arith.extf %1 : vector<4x324xbf16> to vector<4x324xf32>
    %3 = vector.extract_strided_slice %2 {offsets = [0, 305], sizes = [4, 19], strides = [1, 1]} : vector<4x324xf32> to vector<4x19xf32>
    %4 = vector.extract_strided_slice %2 {offsets = [0, 0], sizes = [4, 305], strides = [1, 1]} : vector<4x324xf32> to vector<4x305xf32>
    %5 = tpu.concatenate %3, %4 in 1 : vector<4x19xf32>, vector<4x305xf32> -> vector<4x324xf32>
    %6 = arith.truncf %5 : vector<4x324xf32> to vector<4x324xbf16>
    %c0_2 = arith.constant 0 : index
    %c0_3 = arith.constant 0 : index
    %c0_4 = arith.constant 0 : index
    %7 = vector.load %arg3[%c0_2, %c0_3, %c0_4] : memref<9x32x4xbf16, #tpu.memory_space<vmem>>, vector<1x32x4xbf16>
    %8 = vector.shape_cast %7 : vector<1x32x4xbf16> to vector<32x4xbf16>
    %cst = arith.constant dense<0.000000e+00> : vector<32x324xf32>
    %9 = tpu.matmul %8, %6, %cst {dimension_numbers = #tpu.dot_dimension_numbers<[1], [0], [0], [1], [0, 0, 1, 1], [], []>} : vector<32x4xbf16>, vector<4x324xbf16>, vector<32x324xf32> -> vector<32x324xf32>
    %10 = vector.extract_strided_slice %2 {offsets = [0, 306], sizes = [4, 18], strides = [1, 1]} : vector<4x324xf32> to vector<4x18xf32>
    %11 = vector.extract_strided_slice %2 {offsets = [0, 0], sizes = [4, 306], strides = [1, 1]} : vector<4x324xf32> to vector<4x306xf32>
    %12 = tpu.concatenate %10, %11 in 1 : vector<4x18xf32>, vector<4x306xf32> -> vector<4x324xf32>
    %13 = arith.truncf %12 : vector<4x324xf32> to vector<4x324xbf16>
    %c1 = arith.constant 1 : index
    %c0_5 = arith.constant 0 : index
    %c0_6 = arith.constant 0 : index
    %14 = vector.load %arg3[%c1, %c0_5, %c0_6] : memref<9x32x4xbf16, #tpu.memory_space<vmem>>, vector<1x32x4xbf16>
    %15 = vector.shape_cast %14 : vector<1x32x4xbf16> to vector<32x4xbf16>
    %cst_7 = arith.constant dense<0.000000e+00> : vector<32x324xf32>
    %16 = tpu.matmul %15, %13, %cst_7 {dimension_numbers = #tpu.dot_dimension_numbers<[1], [0], [0], [1], [0, 0, 1, 1], [], []>} : vector<32x4xbf16>, vector<4x324xbf16>, vector<32x324xf32> -> vector<32x324xf32>
    %17 = arith.addf %9, %16 : vector<32x324xf32>
    %18 = vector.extract_strided_slice %2 {offsets = [0, 307], sizes = [4, 17], strides = [1, 1]} : vector<4x324xf32> to vector<4x17xf32>
    %19 = vector.extract_strided_slice %2 {offsets = [0, 0], sizes = [4, 307], strides = [1, 1]} : vector<4x324xf32> to vector<4x307xf32>
    %20 = tpu.concatenate %18, %19 in 1 : vector<4x17xf32>, vector<4x307xf32> -> vector<4x324xf32>
    %21 = arith.truncf %20 : vector<4x324xf32> to vector<4x324xbf16>
    %c2 = arith.constant 2 : index
    %c0_8 = arith.constant 0 : index
    %c0_9 = arith.constant 0 : index
    %22 = vector.load %arg3[%c2, %c0_8, %c0_9] : memref<9x32x4xbf16, #tpu.memory_space<vmem>>, vector<1x32x4xbf16>
    %23 = vector.shape_cast %22 : vector<1x32x4xbf16> to vector<32x4xbf16>
    %cst_10 = arith.constant dense<0.000000e+00> : vector<32x324xf32>
    %24 = tpu.matmul %23, %21, %cst_10 {dimension_numbers = #tpu.dot_dimension_numbers<[1], [0], [0], [1], [0, 0, 1, 1], [], []>} : vector<32x4xbf16>, vector<4x324xbf16>, vector<32x324xf32> -> vector<32x324xf32>
    %25 = arith.addf %17, %24 : vector<32x324xf32>
    %26 = vector.extract_strided_slice %2 {offsets = [0, 323], sizes = [4, 1], strides = [1, 1]} : vector<4x324xf32> to vector<4x1xf32>
    %27 = vector.extract_strided_slice %2 {offsets = [0, 0], sizes = [4, 323], strides = [1, 1]} : vector<4x324xf32> to vector<4x323xf32>
    %28 = tpu.concatenate %26, %27 in 1 : vector<4x1xf32>, vector<4x323xf32> -> vector<4x324xf32>
    %29 = arith.truncf %28 : vector<4x324xf32> to vector<4x324xbf16>
    %c3 = arith.constant 3 : index
    %c0_11 = arith.constant 0 : index
    %c0_12 = arith.constant 0 : index
    %30 = vector.load %arg3[%c3, %c0_11, %c0_12] : memref<9x32x4xbf16, #tpu.memory_space<vmem>>, vector<1x32x4xbf16>
    %31 = vector.shape_cast %30 : vector<1x32x4xbf16> to vector<32x4xbf16>
    %cst_13 = arith.constant dense<0.000000e+00> : vector<32x324xf32>
    %32 = tpu.matmul %31, %29, %cst_13 {dimension_numbers = #tpu.dot_dimension_numbers<[1], [0], [0], [1], [0, 0, 1, 1], [], []>} : vector<32x4xbf16>, vector<4x324xbf16>, vector<32x324xf32> -> vector<32x324xf32>
    %33 = arith.addf %25, %32 : vector<32x324xf32>
    %34 = arith.truncf %2 : vector<4x324xf32> to vector<4x324xbf16>
    %c4 = arith.constant 4 : index
    %c0_14 = arith.constant 0 : index
    %c0_15 = arith.constant 0 : index
    %35 = vector.load %arg3[%c4, %c0_14, %c0_15] : memref<9x32x4xbf16, #tpu.memory_space<vmem>>, vector<1x32x4xbf16>
    %36 = vector.shape_cast %35 : vector<1x32x4xbf16> to vector<32x4xbf16>
    %cst_16 = arith.constant dense<0.000000e+00> : vector<32x324xf32>
    %37 = tpu.matmul %36, %34, %cst_16 {dimension_numbers = #tpu.dot_dimension_numbers<[1], [0], [0], [1], [0, 0, 1, 1], [], []>} : vector<32x4xbf16>, vector<4x324xbf16>, vector<32x324xf32> -> vector<32x324xf32>
    %38 = arith.addf %33, %37 : vector<32x324xf32>
    %39 = vector.extract_strided_slice %2 {offsets = [0, 1], sizes = [4, 323], strides = [1, 1]} : vector<4x324xf32> to vector<4x323xf32>
    %40 = vector.extract_strided_slice %2 {offsets = [0, 0], sizes = [4, 1], strides = [1, 1]} : vector<4x324xf32> to vector<4x1xf32>
    %41 = tpu.concatenate %39, %40 in 1 : vector<4x323xf32>, vector<4x1xf32> -> vector<4x324xf32>
    %42 = arith.truncf %41 : vector<4x324xf32> to vector<4x324xbf16>
    %c5 = arith.constant 5 : index
    %c0_17 = arith.constant 0 : index
    %c0_18 = arith.constant 0 : index
    %43 = vector.load %arg3[%c5, %c0_17, %c0_18] : memref<9x32x4xbf16, #tpu.memory_space<vmem>>, vector<1x32x4xbf16>
    %44 = vector.shape_cast %43 : vector<1x32x4xbf16> to vector<32x4xbf16>
    %cst_19 = arith.constant dense<0.000000e+00> : vector<32x324xf32>
    %45 = tpu.matmul %44, %42, %cst_19 {dimension_numbers = #tpu.dot_dimension_numbers<[1], [0], [0], [1], [0, 0, 1, 1], [], []>} : vector<32x4xbf16>, vector<4x324xbf16>, vector<32x324xf32> -> vector<32x324xf32>
    %46 = arith.addf %38, %45 : vector<32x324xf32>
    %47 = vector.extract_strided_slice %2 {offsets = [0, 17], sizes = [4, 307], strides = [1, 1]} : vector<4x324xf32> to vector<4x307xf32>
    %48 = vector.extract_strided_slice %2 {offsets = [0, 0], sizes = [4, 17], strides = [1, 1]} : vector<4x324xf32> to vector<4x17xf32>
    %49 = tpu.concatenate %47, %48 in 1 : vector<4x307xf32>, vector<4x17xf32> -> vector<4x324xf32>
    %50 = arith.truncf %49 : vector<4x324xf32> to vector<4x324xbf16>
    %c6 = arith.constant 6 : index
    %c0_20 = arith.constant 0 : index
    %c0_21 = arith.constant 0 : index
    %51 = vector.load %arg3[%c6, %c0_20, %c0_21] : memref<9x32x4xbf16, #tpu.memory_space<vmem>>, vector<1x32x4xbf16>
    %52 = vector.shape_cast %51 : vector<1x32x4xbf16> to vector<32x4xbf16>
    %cst_22 = arith.constant dense<0.000000e+00> : vector<32x324xf32>
    %53 = tpu.matmul %52, %50, %cst_22 {dimension_numbers = #tpu.dot_dimension_numbers<[1], [0], [0], [1], [0, 0, 1, 1], [], []>} : vector<32x4xbf16>, vector<4x324xbf16>, vector<32x324xf32> -> vector<32x324xf32>
    %54 = arith.addf %46, %53 : vector<32x324xf32>
    %55 = vector.extract_strided_slice %2 {offsets = [0, 18], sizes = [4, 306], strides = [1, 1]} : vector<4x324xf32> to vector<4x306xf32>
    %56 = vector.extract_strided_slice %2 {offsets = [0, 0], sizes = [4, 18], strides = [1, 1]} : vector<4x324xf32> to vector<4x18xf32>
    %57 = tpu.concatenate %55, %56 in 1 : vector<4x306xf32>, vector<4x18xf32> -> vector<4x324xf32>
    %58 = arith.truncf %57 : vector<4x324xf32> to vector<4x324xbf16>
    %c7 = arith.constant 7 : index
    %c0_23 = arith.constant 0 : index
    %c0_24 = arith.constant 0 : index
    %59 = vector.load %arg3[%c7, %c0_23, %c0_24] : memref<9x32x4xbf16, #tpu.memory_space<vmem>>, vector<1x32x4xbf16>
    %60 = vector.shape_cast %59 : vector<1x32x4xbf16> to vector<32x4xbf16>
    %cst_25 = arith.constant dense<0.000000e+00> : vector<32x324xf32>
    %61 = tpu.matmul %60, %58, %cst_25 {dimension_numbers = #tpu.dot_dimension_numbers<[1], [0], [0], [1], [0, 0, 1, 1], [], []>} : vector<32x4xbf16>, vector<4x324xbf16>, vector<32x324xf32> -> vector<32x324xf32>
    %62 = arith.addf %54, %61 : vector<32x324xf32>
    %63 = vector.extract_strided_slice %2 {offsets = [0, 19], sizes = [4, 305], strides = [1, 1]} : vector<4x324xf32> to vector<4x305xf32>
    %64 = vector.extract_strided_slice %2 {offsets = [0, 0], sizes = [4, 19], strides = [1, 1]} : vector<4x324xf32> to vector<4x19xf32>
    %65 = tpu.concatenate %63, %64 in 1 : vector<4x305xf32>, vector<4x19xf32> -> vector<4x324xf32>
    %66 = arith.truncf %65 : vector<4x324xf32> to vector<4x324xbf16>
    %c8 = arith.constant 8 : index
    %c0_26 = arith.constant 0 : index
    %c0_27 = arith.constant 0 : index
    %67 = vector.load %arg3[%c8, %c0_26, %c0_27] : memref<9x32x4xbf16, #tpu.memory_space<vmem>>, vector<1x32x4xbf16>
    %68 = vector.shape_cast %67 : vector<1x32x4xbf16> to vector<32x4xbf16>
    %cst_28 = arith.constant dense<0.000000e+00> : vector<32x324xf32>
    %69 = tpu.matmul %68, %66, %cst_28 {dimension_numbers = #tpu.dot_dimension_numbers<[1], [0], [0], [1], [0, 0, 1, 1], [], []>} : vector<32x4xbf16>, vector<4x324xbf16>, vector<32x324xf32> -> vector<32x324xf32>
    %70 = arith.addf %62, %69 : vector<32x324xf32>
    %c0_29 = arith.constant 0 : index
    %c0_30 = arith.constant 0 : index
    %71 = vector.load %arg4[%c0_29, %c0_30] : memref<32x1xf32, #tpu.memory_space<vmem>>, vector<32x1xf32>
    %72 = vector.broadcast %71 : vector<32x1xf32> to vector<32x324xf32>
    %73 = arith.addf %70, %72 : vector<32x324xf32>
    %cst_31 = arith.constant 0.000000e+00 : f32
    %74 = vector.broadcast %cst_31 : f32 to vector<32x324xf32>
    %75 = arith.maximumf %73, %74 : vector<32x324xf32>
    %76 = arith.truncf %75 : vector<32x324xf32> to vector<32x324xbf16>
    %c0_32 = arith.constant 0 : index
    %c0_33 = arith.constant 0 : index
    %77 = vector.load %arg5[%c0_32, %c0_33] : memref<4x32xbf16, #tpu.memory_space<vmem>>, vector<4x32xbf16>
    %cst_34 = arith.constant dense<0.000000e+00> : vector<4x324xf32>
    %78 = tpu.matmul %77, %76, %cst_34 {dimension_numbers = #tpu.dot_dimension_numbers<[1], [0], [0], [1], [0, 0, 1, 1], [], []>} : vector<4x32xbf16>, vector<32x324xbf16>, vector<4x324xf32> -> vector<4x324xf32>
    %c0_35 = arith.constant 0 : index
    %c0_36 = arith.constant 0 : index
    %79 = vector.load %arg6[%c0_35, %c0_36] : memref<4x1xf32, #tpu.memory_space<vmem>>, vector<4x1xf32>
    %80 = vector.broadcast %79 : vector<4x1xf32> to vector<4x324xf32>
    %81 = arith.addf %78, %80 : vector<4x324xf32>
    %82 = arith.negf %81 : vector<4x324xf32>
    %83 = math.exp %82 : vector<4x324xf32>
    %cst_37 = arith.constant 1.000000e+00 : f32
    %84 = vector.broadcast %cst_37 : f32 to vector<4x324xf32>
    %85 = arith.addf %84, %83 : vector<4x324xf32>
    %86 = arith.divf %84, %85 : vector<4x324xf32>
    %c0_38 = arith.constant 0 : index
    %c0_39 = arith.constant 0 : index
    %87 = vector.load %arg2[%c0_38, %c0_39] : memref<1x324xf32, #tpu.memory_space<vmem>>, vector<1x324xf32>
    %88 = vector.broadcast %87 : vector<1x324xf32> to vector<4x324xf32>
    %89 = arith.mulf %86, %88 : vector<4x324xf32>
    %90 = tpu.concatenate %87, %89 in 0 : vector<1x324xf32>, vector<4x324xf32> -> vector<5x324xf32>
    %91 = arith.truncf %90 : vector<5x324xf32> to vector<5x324xbf16>
    %cst_40 = arith.constant dense<0.000000e+00> : vector<5x32xf32>
    %92 = tpu.matmul %91, %76, %cst_40 {dimension_numbers = #tpu.dot_dimension_numbers<[1], [1], [0], [0], [0, 0, 1, 0], [], []>} : vector<5x324xbf16>, vector<32x324xbf16>, vector<5x32xf32> -> vector<5x32xf32>
    %cst_41 = arith.constant 3.906250e-03 : f32
    %93 = vector.broadcast %cst_41 : f32 to vector<5x32xf32>
    %94 = arith.mulf %92, %93 : vector<5x32xf32>
    %95 = arith.truncf %94 : vector<5x32xf32> to vector<5x32xbf16>
    %c0_42 = arith.constant 0 : index
    %c0_43 = arith.constant 0 : index
    %96 = vector.load %arg7[%c0_42, %c0_43] : memref<32x128xbf16, #tpu.memory_space<vmem>>, vector<32x128xbf16>
    %cst_44 = arith.constant dense<0.000000e+00> : vector<5x128xf32>
    %97 = tpu.matmul %95, %96, %cst_44 {dimension_numbers = #tpu.dot_dimension_numbers<[1], [0], [0], [1], [0, 0, 1, 1], [], []>} : vector<5x32xbf16>, vector<32x128xbf16>, vector<5x128xf32> -> vector<5x128xf32>
    %c0_45 = arith.constant 0 : index
    %c0_46 = arith.constant 0 : index
    %98 = vector.load %arg8[%c0_45, %c0_46] : memref<1x128xf32, #tpu.memory_space<vmem>>, vector<1x128xf32>
    %99 = vector.broadcast %98 : vector<1x128xf32> to vector<5x128xf32>
    %100 = arith.addf %97, %99 : vector<5x128xf32>
    %cst_47 = arith.constant dense<0xFF800000> : vector<5xf32>
    %101 = vector.multi_reduction <maximumf>, %100, %cst_47 [1] : vector<5x128xf32> to vector<5xf32>
    %102 = vector.shape_cast %101 : vector<5xf32> to vector<5x1xf32>
    %103 = vector.broadcast %102 : vector<5x1xf32> to vector<5x128xf32>
    %104 = arith.subf %100, %103 : vector<5x128xf32>
    %105 = math.exp %104 : vector<5x128xf32>
    %cst_48 = arith.constant dense<0.000000e+00> : vector<5xf32>
    %106 = vector.multi_reduction <add>, %105, %cst_48 [1] : vector<5x128xf32> to vector<5xf32>
    %107 = vector.shape_cast %106 : vector<5xf32> to vector<5x1xf32>
    %108 = tpu.reciprocal %107 {approx = true} : vector<5x1xf32> -> vector<5x1xf32>
    %109 = vector.broadcast %108 : vector<5x1xf32> to vector<5x128xf32>
    %110 = arith.mulf %105, %109 : vector<5x128xf32>
    %c0_49 = arith.constant 0 : index
    %c0_50 = arith.constant 0 : index
    %c0_51 = arith.constant 0 : index
    %111 = vector.load %arg16[%c0_49, %c0_50, %c0_51] : memref<1x5x128xf32, #tpu.memory_space<vmem>>, vector<1x5x128xf32>
    %112 = vector.shape_cast %111 : vector<1x5x128xf32> to vector<5x128xf32>
    %113 = vector.shape_cast %110 : vector<5x128xf32> to vector<1x5x128xf32>
    tpu.vector_store %arg16[%c0_49, %c0_50, %c0_51], %113 {strides = array<i32>} : memref<1x5x128xf32, #tpu.memory_space<vmem>>, vector<1x5x128xf32>,
    %c0_52 = arith.constant 0 : index
    %c0_53 = arith.constant 0 : index
    %114 = vector.load %arg9[%c0_52, %c0_53] : memref<32x512xbf16, #tpu.memory_space<vmem>>, vector<32x512xbf16>
    %cst_54 = arith.constant dense<0.000000e+00> : vector<5x512xf32>
    %115 = tpu.matmul %95, %114, %cst_54 {dimension_numbers = #tpu.dot_dimension_numbers<[1], [0], [0], [1], [0, 0, 1, 1], [], []>} : vector<5x32xbf16>, vector<32x512xbf16>, vector<5x512xf32> -> vector<5x512xf32>
    %c0_55 = arith.constant 0 : index
    %c0_56 = arith.constant 0 : index
    %116 = vector.load %arg10[%c0_55, %c0_56] : memref<1x512xf32, #tpu.memory_space<vmem>>, vector<1x512xf32>
    %117 = vector.broadcast %116 : vector<1x512xf32> to vector<5x512xf32>
    %118 = arith.addf %115, %117 : vector<5x512xf32>
    %cst_57 = arith.constant 0.000000e+00 : f32
    %119 = vector.broadcast %cst_57 : f32 to vector<5x512xf32>
    %120 = arith.maximumf %118, %119 : vector<5x512xf32>
    %121 = arith.truncf %120 : vector<5x512xf32> to vector<5x512xbf16>
    %c0_58 = arith.constant 0 : index
    %c0_59 = arith.constant 0 : index
    %122 = vector.load %arg11[%c0_58, %c0_59] : memref<512x128xbf16, #tpu.memory_space<vmem>>, vector<512x128xbf16>
    %cst_60 = arith.constant dense<0.000000e+00> : vector<5x128xf32>
    %123 = tpu.matmul %121, %122, %cst_60 {dimension_numbers = #tpu.dot_dimension_numbers<[1], [0], [0], [1], [0, 0, 1, 1], [], []>} : vector<5x512xbf16>, vector<512x128xbf16>, vector<5x128xf32> -> vector<5x128xf32>
    %c0_61 = arith.constant 0 : index
    %c0_62 = arith.constant 0 : index
    %124 = vector.load %arg12[%c0_61, %c0_62] : memref<1x128xf32, #tpu.memory_space<vmem>>, vector<1x128xf32>
    %125 = vector.broadcast %124 : vector<1x128xf32> to vector<5x128xf32>
    %126 = arith.addf %123, %125 : vector<5x128xf32>
    %cst_63 = arith.constant 0.000000e+00 : f32
    %127 = vector.broadcast %cst_63 : f32 to vector<5x128xf32>
    %128 = arith.maximumf %126, %127 : vector<5x128xf32>
    %129 = arith.truncf %128 : vector<5x128xf32> to vector<5x128xbf16>
    %c0_64 = arith.constant 0 : index
    %c0_65 = arith.constant 0 : index
    %130 = vector.load %arg13[%c0_64, %c0_65] : memref<128x128xbf16, #tpu.memory_space<vmem>>, vector<128x128xbf16>
    %cst_66 = arith.constant dense<0.000000e+00> : vector<5x128xf32>
    %131 = tpu.matmul %129, %130, %cst_66 {dimension_numbers = #tpu.dot_dimension_numbers<[1], [0], [0], [1], [0, 0, 1, 1], [], []>} : vector<5x128xbf16>, vector<128x128xbf16>, vector<5x128xf32> -> vector<5x128xf32>
    %c0_67 = arith.constant 0 : index
    %c0_68 = arith.constant 0 : index
    %132 = vector.load %arg14[%c0_67, %c0_68] : memref<1x128xf32, #tpu.memory_space<vmem>>, vector<1x128xf32>
    %133 = vector.broadcast %132 : vector<1x128xf32> to vector<5x128xf32>
    %134 = arith.addf %131, %133 : vector<5x128xf32>
    %c0_69 = arith.constant 0 : index
    %c0_70 = arith.constant 0 : index
    %c0_71 = arith.constant 0 : index
    %135 = vector.load %arg15[%c0_69, %c0_70, %c0_71] : memref<1x5x128xf32, #tpu.memory_space<vmem>>, vector<1x5x128xf32>
    %136 = vector.shape_cast %135 : vector<1x5x128xf32> to vector<5x128xf32>
    %137 = vector.shape_cast %134 : vector<5x128xf32> to vector<1x5x128xf32>
    tpu.vector_store %arg15[%c0_69, %c0_70, %c0_71], %137 {strides = array<i32>} : memref<1x5x128xf32, #tpu.memory_space<vmem>>, vector<1x5x128xf32>,
    return
  }
  func.func @transform_0(%arg0: i32) -> (i32, i32, i32) {
    %c0_i32 = arith.constant 0 : i32
    %c0_i32_0 = arith.constant 0 : i32
    %c0_i32_1 = arith.constant 0 : i32
    return %arg0, %c0_i32, %c0_i32_0 : i32, i32, i32
  }
  func.func @transform_1(%arg0: i32) -> (i32, i32) {
    %c0_i32 = arith.constant 0 : i32
    %c0_i32_0 = arith.constant 0 : i32
    %c0_i32_1 = arith.constant 0 : i32
    return %c0_i32, %c0_i32_0 : i32, i32
  }
  func.func @transform_2(%arg0: i32) -> (i32, i32, i32) {
    %c0_i32 = arith.constant 0 : i32
    %c0_i32_0 = arith.constant 0 : i32
    %c0_i32_1 = arith.constant 0 : i32
    %c0_i32_2 = arith.constant 0 : i32
    return %c0_i32, %c0_i32_0, %c0_i32_1 : i32, i32, i32
  }
  func.func @transform_3(%arg0: i32) -> (i32, i32) {
    %c0_i32 = arith.constant 0 : i32
    %c0_i32_0 = arith.constant 0 : i32
    %c0_i32_1 = arith.constant 0 : i32
    return %c0_i32, %c0_i32_0 : i32, i32
  }
  func.func @transform_4(%arg0: i32) -> (i32, i32) {
    %c0_i32 = arith.constant 0 : i32
    %c0_i32_0 = arith.constant 0 : i32
    %c0_i32_1 = arith.constant 0 : i32
    return %c0_i32, %c0_i32_0 : i32, i32
  }
  func.func @transform_5(%arg0: i32) -> (i32, i32) {
    %c0_i32 = arith.constant 0 : i32
    %c0_i32_0 = arith.constant 0 : i32
    %c0_i32_1 = arith.constant 0 : i32
    return %c0_i32, %c0_i32_0 : i32, i32
  }
  func.func @transform_6(%arg0: i32) -> (i32, i32) {
    %c0_i32 = arith.constant 0 : i32
    %c0_i32_0 = arith.constant 0 : i32
    %c0_i32_1 = arith.constant 0 : i32
    return %c0_i32, %c0_i32_0 : i32, i32
  }
  func.func @transform_7(%arg0: i32) -> (i32, i32) {
    %c0_i32 = arith.constant 0 : i32
    %c0_i32_0 = arith.constant 0 : i32
    %c0_i32_1 = arith.constant 0 : i32
    return %c0_i32, %c0_i32_0 : i32, i32
  }
  func.func @transform_8(%arg0: i32) -> (i32, i32) {
    %c0_i32 = arith.constant 0 : i32
    %c0_i32_0 = arith.constant 0 : i32
    %c0_i32_1 = arith.constant 0 : i32
    return %c0_i32, %c0_i32_0 : i32, i32
  }
  func.func @transform_9(%arg0: i32) -> (i32, i32) {
    %c0_i32 = arith.constant 0 : i32
    %c0_i32_0 = arith.constant 0 : i32
    %c0_i32_1 = arith.constant 0 : i32
    return %c0_i32, %c0_i32_0 : i32, i32
  }
  func.func @transform_10(%arg0: i32) -> (i32, i32) {
    %c0_i32 = arith.constant 0 : i32
    %c0_i32_0 = arith.constant 0 : i32
    %c0_i32_1 = arith.constant 0 : i32
    return %c0_i32, %c0_i32_0 : i32, i32
  }
  func.func @transform_11(%arg0: i32) -> (i32, i32) {
    %c0_i32 = arith.constant 0 : i32
    %c0_i32_0 = arith.constant 0 : i32
    %c0_i32_1 = arith.constant 0 : i32
    return %c0_i32, %c0_i32_0 : i32, i32
  }
  func.func @transform_12(%arg0: i32) -> (i32, i32) {
    %c0_i32 = arith.constant 0 : i32
    %c0_i32_0 = arith.constant 0 : i32
    %c0_i32_1 = arith.constant 0 : i32
    return %c0_i32, %c0_i32_0 : i32, i32
  }
  func.func @transform_13(%arg0: i32) -> (i32, i32) {
    %c0_i32 = arith.constant 0 : i32
    %c0_i32_0 = arith.constant 0 : i32
    %c0_i32_1 = arith.constant 0 : i32
    return %c0_i32, %c0_i32_0 : i32, i32
  }
  func.func @transform_14(%arg0: i32) -> (i32, i32, i32) {
    %c0_i32 = arith.constant 0 : i32
    %c0_i32_0 = arith.constant 0 : i32
    %c0_i32_1 = arith.constant 0 : i32
    return %arg0, %c0_i32, %c0_i32_0 : i32, i32, i32
  }
  func.func @transform_15(%arg0: i32) -> (i32, i32, i32) {
    %c0_i32 = arith.constant 0 : i32
    %c0_i32_0 = arith.constant 0 : i32
    %c0_i32_1 = arith.constant 0 : i32
    return %arg0, %c0_i32, %c0_i32_0 : i32, i32, i32
  }
}

</mosaic_0001>

<bundles_post_ra>
// kernel: ra_net_forward.1
= control target key start
LH: loop header
LB: loop body
LE: loop exit
PB: predicated region body
PF: predicated region fallthrough
CT: control target
= control target key end

     0   :  { %s3660_s18 = smov 0   ;;  %s4307_s0 = inlined_call_operand.vmem [shape: bf16[2,4,324], index: 0, kind: input, shape index: {}]   ;;  %s4308_s1 = inlined_call_operand.vmem [shape: f32[1,324], index: 1, kind: input, shape index: {}]   ;;  %s4309_s2 = inlined_call_operand.vmem [shape: bf16[9,32,4], index: 2, kind: input, shape index: {}]   ;;  %s4310_s3 = inlined_call_operand.vmem [shape: f32[32,1], index: 3, kind: input, shape index: {}]   ;;  %s4311_s4 = inlined_call_operand.vmem [shape: bf16[4,32], index: 4, kind: input, shape index: {}]   ;;  %s4312_s5 = inlined_call_operand.vmem [shape: f32[4,1], index: 5, kind: input, shape index: {}]   ;;  %s4313_s6 = inlined_call_operand.vmem [shape: bf16[32,128], index: 6, kind: input, shape index: {}]   ;;  %s4314_s7 = inlined_call_operand.vmem [shape: f32[1,128], index: 7, kind: input, shape index: {}]   ;;  %s4315_s8 = inlined_call_operand.vmem [shape: bf16[32,512], index: 8, kind: input, shape index: {}]   ;;  %s4316_s9 = inlined_call_operand.vmem [shape: f32[1,512], index: 9, kind: input, shape index: {}]   ;;  %s4317_s10 = inlined_call_operand.vmem [shape: bf16[512,128], index: 10, kind: input, shape index: {}]   ;;  %s4318_s11 = inlined_call_operand.vmem [shape: f32[1,128], index: 11, kind: input, shape index: {}]   ;;  %s4319_s12 = inlined_call_operand.vmem [shape: bf16[128,128], index: 12, kind: input, shape index: {}]   ;;  %s4320_s13 = inlined_call_operand.vmem [shape: f32[1,128], index: 13, kind: input, shape index: {}]   ;;  %s4321_s14 = inlined_call_operand.vmem [shape: f32[2,5,128], index: 14, kind: output, shape index: {0}]   ;;  %s4322_s15 = inlined_call_operand.vmem [shape: f32[2,5,128], index: 15, kind: output, shape index: {1}]  }
   0x1 LB: > { %s3029_s19 = sadd.s32 4294967295, %s3558_s18   ;;  %p3033_p0 = scmp.ge.s32.totalorder %s3558_s18, 1  ;;  %s3558_s18 = sphi %s3660_s18, %s26_s18  }
   0x2   : > { %p440_p1 = scmp.lt.s32.totalorder %s3558_s18, 3 }
   0x4   : > { %p441_p2 = pnand %p3033_p0, %p440_p1 }
   0x6   : > { %444 = sbr.rel (%p441_p2) target bundleno = 1517 (0x5ed), region = 76 }
   0xb   : > { %p491_p3 = scmp.lt.s32.totalorder %s3029_s19, 1  ;;  %v4323_v3 = vmov 0   ;;  %s3561_s24 = smov 78   ;;  %v3684_v7 = vld [vmem:[%s4309_s2] sm:$0xff]   ;;  %vm568_vm0 = vcmask 31744   ;;  %v1960_v9 = vld [vmem:[%s4310_s3 + $0x18] sm:$0xff]  ;;  %v1160_v24 = vlaneseq }
   0xc   : > { %617 = vmatprep.mubr.bf16.mxu1 %v4323_v3  ;;  %3462 = vset.pattern.permute.xlu1 %v4323_v3  ;;  %s3562_s25 = smov 18   ;;  %s3563_s26 = smov 19   ;;  %v1959_v10 = vld [vmem:[%s4310_s3 + $0x10] sm:$0xff]  ;;  %v1957_v13 = vld [vmem:[%s4310_s3] sm:$0xff]  ;;  %v1958_v14 = vld [vmem:[%s4310_s3 + $0x8] sm:$0xff]  ;;  %vm543_vm1 = vcmask 146432  }
   0xd   : > { %s4358_s19 = smov (!%p491_p3, %s3029_s19), 1  ;;  %3461 = vset.pattern.permute.xlu0 %v4323_v3  ;;  %s3564_s27 = smov 79   ;;  %3293 = vmatprep.mubr.msk.bf16.mxu0 %vm568_vm0, %v3684_v7  ;;  %vm520_vm2 = vcmask 154624   ;;  %v3577_v17 = vmov 1983009808   ;;  %vm575_vm3 = vcmask 1041408  }
   0xe   : > { %s3392_s20 = smul.u32 6, %s4358_s19  ;;  %s3565_s30 = smov 17   ;;  %v1158_v18 = vunpack.c.l.s4 %v3577_v17  ;;  %v2012_v19 = vld [vmem:[%s4312_s5] sm:$0xf]  ;;  %v3463_v38 = vld [vmem:[%s4309_s2 + $0x10] sm:$0xff]   ;;  %v3715_v40 = vld [vmem:[%s4309_s2 + $0x8] sm:$0xff]  }
   0xf   : > { %s3566_s16 = smov 77   ;;  %s3567_s17 = smov 1   ;;  %v3717_v41 = vshrl.u32 %v1160_v24, 7  ;;  %vm823_vm4 = vcmask 138240   ;;  %vm986_vm5 = vcmask 7168   ;;  %v3464_v56 = vld [vmem:[%s4309_s2 + $0x18] sm:$0xff]  }
  0x10   : > { %s495_s23 = scalar_lea.vmem %s4307_s0, %s3392_s20  ;;  %s3568_s20 = smov 61   ;;  %v1159_v35 = vunpack.c.0.s8 %v1158_v18  ;;  %v3467_v58 = vld [vmem:[%s4309_s2 + $0x20] sm:$0xff]   ;;  %vm1316_vm6 = vcmask 547840   ;;  %v3776_v18 = vld [vmem:[%s4309_s2 + $0x38] sm:$0xff]   ;;  %vm1471_vm7 = vcmask 908288   ;;  %vm1307_vm8 = vcmask 1039360  }
  0x11   : > { %v3674_v0 = vld [vmem:[%s495_s23] sm:$0x3f]  ;;  %s3569_s21 = smov 127   ;;  %s3570_s22 = smov 67   ;;  %4329 = vst [vmem:[#allocation2_spill] sm:$0xff] %v3717_v41  ;;  %vm1644_vm9 = vcmask 408576  }
  0x12   : > { %v507_v1 = vunpack.c.h.bf16 %v3674_v0  ;;  %v506_v2 = vunpack.c.l.bf16 %v3674_v0  ;;  %s3571_s23 = smov 111   ;;  %s3576_s28 = smov 49   ;;  %v3725_v48 = vsub.s32 %v1159_v35, %v3717_v41  ;;  %vm1799_vm10 = vcmask 891904  }
  0x13   : > { %vm1480_vm11 = vcmask 416768   ;;  %vm1635_vm12 = vcmask 900096   ;;  %vm1808_vm13 = vcmask 400384   ;;  %vm3579_vm14 = vmmov 0  }
  0x14   : > { %534 = vrot.lane.b32.xlu0 %v507_v1, %s3561_s24  ;;  %v513_v4 = vcombine.high %v506_v2, %v506_v2  ;;  %541 = vrot.lane.b32.xlu1 %v507_v1, %s3562_s25  ;;  %v3441_v8 = vpack.i.bf16 %v506_v2, %v507_v1  ;;  %s3572_s24 = smov 51   ;;  %v1163_v59 = vrot.slane %v3674_v0, %v3725_v48  ;;  %vm2018_vm15 = vcmask 261120  }
  0x16   : > { %v3421_v5 = vpack.i.bf16 %v513_v4, %v506_v2  ;;  %v3426_v6 = vpack.i.bf16 %v507_v1, %v513_v4 }
  0x18   : > { %3422 = vrot.lane.b32.xlu0 %v3421_v5, %s3562_s25  ;;  %3427 = vrot.lane.b32.xlu1 %v3426_v6, %s3563_s26  ;;  %s3573_s25 = smov 110  }
  0x1c   : > { %514 = vrot.lane.b32.xlu1 %v506_v2, %s3563_s26  ;;  %509 = vrot.lane.b32.xlu0 %v507_v1, %s3564_s27  ;;  %s3574_s26 = smov 50   ;;  %s3575_s27 = smov 109  }
  0x20   : > { %3432 = vrot.lane.b32.xlu1 %v3421_v5, %s3565_s30  ;;  %814 = vrot.lane.b32.xlu0 %v507_v1, %s3566_s16 }
  0x24   : > { %821 = vrot.lane.b32.xlu0 %v507_v1, %s3565_s30  ;;  %3437 = vrot.lane.b32.xlu1 %v3426_v6, %s3567_s17 }
  0x28   : > { %980 = vrot.lane.b32.xlu1 %v506_v2, %s3567_s17  ;;  %977 = vrot.lane.b32.xlu0 %v507_v1, %s3568_s20 }
  0x2c   : > { %3442 = vrot.lane.b32.xlu0 %v3441_v8, %s3569_s21  ;;  %1313 = vrot.lane.b32.xlu1 %v506_v2, %s3570_s22 }
  0x30   : > { %1303 = vrot.lane.b32.xlu0 %v513_v4, %s3569_s21  ;;  %3447 = vrot.lane.b32.xlu1 %v3421_v5, %s3571_s23 }
  0x34   : > { %1469 = vrot.lane.b32.xlu0 %v507_v1, %s3571_s23  ;;  %1477 = vrot.lane.b32.xlu1 %v506_v2, %s3572_s24 }
  0x38   : > { %3452 = vrot.lane.b32.xlu0 %v3441_v8, %s3573_s25  ;;  %1641 = vrot.lane.b32.xlu1 %v506_v2, %s3574_s26  ;;  %v3468_v8 = vld [vmem:[%s4309_s2 + $0x28] sm:$0xff]  }
  0x3c   : > { %1631 = vrot.lane.b32.xlu0 %v513_v4, %s3573_s25  ;;  %3457 = vrot.lane.b32.xlu1 %v3421_v5, %s3575_s27 }
  0x40   : > { %1797 = vrot.lane.b32.xlu0 %v507_v1, %s3575_s27  ;;  %1805 = vrot.lane.b32.xlu1 %v506_v2, %s3576_s28  ;;  %v1171_v2 = vcombine.high %v1163_v59, %v1163_v59  ;;  %s3035_s27 = sshll.u32 %s4358_s19, 3 }
  0x41   : > { %s503_s30 = scalar_lea.vmem %s4322_s15, %s3035_s27  ;;  %s499_s22 = scalar_lea.vmem %s4321_s14, %s3035_s27 }
  0x44   : > { %1978 = vperm.xlu1 %3462, %v1960_v9   ;;  %1973 = vperm.xlu0 %3461, %v1959_v10  }
  0x48   : > { %1963 = vperm.xlu1 %3462, %v1957_v13   ;;  %1968 = vperm.xlu0 %3461, %v1958_v14   ;;  %v3761_v13 = vld [vmem:[%s4309_s2 + $0x30] sm:$0xff]  }
  0x4c   : > { %2015 = vperm.xlu1 %3462, %v2012_v19  }
  0x86   : > { %v535_v11 = vpop.permute.xlu0 %534  ;;  %v542_v12 = vpop.permute.xlu1 %541 }
  0x8a   : > { %v3423_v15 = vpop.permute.xlu0 %3422  ;;  %v3428_v16 = vpop.permute.xlu1 %3427 }
  0x8b   : > { %v3425_v20 = vunpack.i.h.bf16 %v3423_v15  ;;  %v3424_v21 = vunpack.i.l.bf16 %v3423_v15  ;;  %v3430_v22 = vunpack.i.h.bf16 %v3428_v16  ;;  %v3429_v23 = vunpack.i.l.bf16 %v3428_v16 }
  0x8d   : > { %v545_v25 = vsel %vm543_vm1, %v3425_v20, %v542_v12  ;;  %v544_v26 = vsel %vm543_vm1, %v3424_v21, %v3425_v20  ;;  %v549_v27 = vsel %vm543_vm1, %v535_v11, %v3424_v21  ;;  %v522_v28 = vsel %vm520_vm2, %v3429_v23, %v3430_v22 }
  0x8e   : > { %v551_v29 = vpack.c.bf16 %v544_v26, %v544_v26  ;;  %v550_v30 = vpack.c.bf16 %v549_v27, %v549_v27  ;;  %v515_v31 = vpop.permute.xlu1 %514  ;;  %v529_v32 = vpack.c.bf16 %v522_v28, %v522_v28  ;;  %v510_v33 = vpop.permute.xlu0 %509  ;;  %v552_v36 = vpack.c.bf16 %v545_v25, %v545_v25 }
  0x8f   : > { %v521_v34 = vsel %vm520_vm2, %v515_v31, %v3429_v23  ;;  %v526_v63 = vsel %vm520_vm2, %v510_v33, %v515_v31  ;;  %v1179_v23 = vsel %vm575_vm3, %v1163_v59, 0  ;;  %v3473_v33 = vld [vmem:[%s4309_s2 + $0x48] sm:$0xff]   ;;  %vm2150_vm1 = vcmask 1040384  }
  0x90   : > { %3043 = vmatprep.subr.msk.bf16.mxu1 %vm575_vm3, %v551_v29  ;;  %v577_v37 = vsel %vm575_vm3, %v550_v30, 0  ;;  %3384 = vmatprep.subr.msk.bf16.mxu0 %vm575_vm3, %v529_v32  ;;  %v710_v39 = vsel %vm575_vm3, %v529_v32, 0  ;;  %v528_v42 = vpack.c.bf16 %v521_v34, %v521_v34  ;;  %v583_v47 = vsel %vm575_vm3, %v552_v36, 0 }
  0x91   : > { %600 = vmatpush1.bf16.msra.mxu1 %v577_v37  ;;  %3292 = vmatpush3.bf16.msra.mxu0 %v710_v39  ;;  %v527_v5 = vpack.c.bf16 %v526_v63, %v526_v63  ;;  %v1156_v32 = vcombine.high %v3674_v0, %v3674_v0  ;;  %v3815_v39 = vld [vmem:[%s4309_s2 + $0x50] sm:$0xff]   ;;  %v3477_v63 = vld [vmem:[%s4309_s2 + $0x68] sm:$0xff]   ;;  %vm2315_vm2 = vcmask 1044480  }
  0x92   : > { %3383 = vmatprep.subr.msk.bf16.mxu1 %vm575_vm3, %v552_v36  ;;  %v3433_v43 = vpop.permute.xlu1 %3432  ;;  %v815_v44 = vpop.permute.xlu0 %814 }
  0x93   : > { %v3435_v45 = vunpack.i.h.bf16 %v3433_v43  ;;  %v3434_v46 = vunpack.i.l.bf16 %v3433_v43  ;;  %v704_v11 = vsel %vm575_vm3, %v527_v5, 0  ;;  %v3478_v5 = vld [vmem:[%s4309_s2 + $0x70] sm:$0xff]  }
  0x94   : > { %3044 = vmatmul.mubr.msk.bf16.vlgmr.msra.gmra.mxu1 %vm568_vm0, %v3463_v38  ;;  %3294 = vmatmul.mubr.msk.bf16.vlgmr.msra.gmra.mxu0 %vm568_vm0, %v3715_v40 }
  0x95   : > { %3286 = vmatpush3.bf16.msra.mxu1 %v583_v47  ;;  %627 = vmatprep.mubr.bf16.mxu1 %v4323_v3  ;;  %v824_v49 = vsel %vm823_vm4, %v3434_v46, %v3435_v45  ;;  %v829_v50 = vsel %vm823_vm4, %v815_v44, %v3434_v46  ;;  %v3832_v46 = vld [vmem:[%s4309_s2 + $0x58] sm:$0xff]  }
  0x96   : > { %v831_v51 = vpack.c.bf16 %v824_v49, %v824_v49  ;;  %v830_v52 = vpack.c.bf16 %v829_v50, %v829_v50  ;;  %3050 = vmatprep.subr.msk.bf16.mxu1 %vm575_vm3, %v528_v42  ;;  %895 = vmatprep.mubr.bf16.mxu0 %v4323_v3  ;;  %v3438_v53 = vpop.permute.xlu1 %3437  ;;  %v822_v60 = vpop.permute.xlu0 %821 }
  0x97   : > { %v3440_v54 = vunpack.i.h.bf16 %v3438_v53  ;;  %v3439_v55 = vunpack.i.l.bf16 %v3438_v53  ;;  %v825_v6 = vsel %vm823_vm4, %v3435_v45, %v822_v60 }
  0x98   : > { %3061 = vmatprep.subr.msk.bf16.mxu0 %vm575_vm3, %v831_v51  ;;  %v855_v57 = vsel %vm575_vm3, %v830_v52, 0  ;;  %v832_v12 = vpack.c.bf16 %v825_v6, %v825_v6 }
  0x99   : > { %878 = vmatpush1.bf16.msra.mxu0 %v855_v57  ;;  %v988_v61 = vsel %vm986_vm5, %v3439_v55, %v3440_v54 }
  0x9a   : > { %v995_v62 = vpack.c.bf16 %v988_v61, %v988_v61  ;;  %v978_v4 = vpop.permute.xlu0 %977  ;;  %v981_v9 = vpop.permute.xlu1 %980  ;;  %v861_v21 = vsel %vm575_vm3, %v832_v12, 0 }
  0x9b   : > { %v987_v16 = vsel %vm986_vm5, %v981_v9, %v3439_v55  ;;  %v992_v28 = vsel %vm986_vm5, %v978_v4, %v981_v9 }
  0x9c   : > { %3045 = vmatmul.mubr.msk.bf16.gmra.mxu1 %vm568_vm0, %v3464_v56  ;;  %3062 = vmatmul.mubr.msk.bf16.vlgmr.msra.gmra.mxu0 %vm568_vm0, %v3467_v58  ;;  %v1024_v1 = vsel %vm575_vm3, %v995_v62, 0  ;;  %v994_v22 = vpack.c.bf16 %v987_v16, %v987_v16  ;;  %v993_v31 = vpack.c.bf16 %v992_v28, %v992_v28 }
  0x9d   : > { %3287 = vmatprep.mubr.msk.bf16.mxu1 %vm568_vm0, %v3463_v38  ;;  %905 = vmatprep.mubr.bf16.mxu0 %v4323_v3  ;;  %v1170_v38 = vrot.slane %v1156_v32, %v3725_v48 }
  0x9e   : > { %3386 = vmatprep.subr.msk.bf16.mxu0 %vm575_vm3, %v995_v62  ;;  %v3755_v10 = vpop.permute.xlu0 %3442  ;;  %v1314_v15 = vpop.permute.xlu1 %1313  ;;  %v1018_v37 = vsel %vm575_vm3, %v993_v31, 0 }
  0x9f   : > { %3304 = vmatpush3.bf16.msra.mxu0 %v1024_v1  ;;  %v3444_v14 = vunpack.i.l.bf16 %v3755_v10  ;;  %v1185_v50 = vsel %vm575_vm3, %v1170_v38, 0  ;;  %v3445_v55 = vunpack.i.h.bf16 %v3755_v10  ;;  %v3479_v10 = vld [vmem:[%s4309_s2 + $0x78] sm:$0xff]  }
  0xa0   : > { %3083 = vmatprep.subr.msk.bf16.mxu0 %vm575_vm3, %v1171_v2 }
  0xa1   : > { %v1317_v19 = vsel %vm1316_vm6, %v3444_v14, %v1314_v15  ;;  %v3480_v15 = vld [vmem:[%s4309_s2 + $0x80] sm:$0xff]  }
  0xa2   : > { %v3771_v17 = vpop.permute.xlu0 %1303  ;;  %v3448_v20 = vpop.permute.xlu1 %3447  ;;  %v1320_v24 = vpack.c.bf16 %v1317_v19, %v1317_v19 }
  0xa3   : > { %v3450_v25 = vunpack.i.h.bf16 %v3448_v20  ;;  %v3449_v34 = vunpack.i.l.bf16 %v3448_v20  ;;  %v1309_v43 = vsel %vm1307_vm8, %v3771_v17, %v3444_v14  ;;  %v3481_v20 = vld [vmem:[%s4309_s2 + $0x88] sm:$0xff]  }
  0xa4   : > { %3288 = vmatmul.mubr.msk.bf16.vlgmr.msra.gmra.mxu1 %vm568_vm0, %v3464_v56  ;;  %3063 = vmatmul.mubr.msk.bf16.gmra.mxu0 %vm568_vm0, %v3468_v8  ;;  %v1349_v29 = vsel %vm575_vm3, %v1320_v24, 0  ;;  %v1319_v49 = vpack.c.bf16 %v1309_v43, %v1309_v43  ;;  %v3476_v56 = vld [vmem:[%s4309_s2 + $0x60] sm:$0xff]  }
  0xa5   : > { %727 = vmatpush1.bf16.msra.mxu1 %v704_v11  ;;  %744 = vmatprep.mubr.bf16.mxu1 %v4323_v3  ;;  %v1472_v0 = vsel %vm1471_vm7, %v3449_v34, %v3450_v25 }
  0xa6   : > { %3385 = vmatprep.subr.msk.bf16.mxu1 %vm575_vm3, %v832_v12  ;;  %3305 = vmatprep.mubr.msk.bf16.mxu0 %vm568_vm0, %v3761_v13  ;;  %v3785_v26 = vpop.permute.xlu0 %1469  ;;  %v1478_v35 = vpop.permute.xlu1 %1477  ;;  %v1482_v44 = vpack.c.bf16 %v1472_v0, %v1472_v0 }
  0xa7   : > { %v1473_v27 = vsel %vm1471_vm7, %v3450_v25, %v3785_v26  ;;  %v1481_v62 = vsel %vm1480_vm11, %v3785_v26, %v1478_v35 }
  0xa8   : > { %v1483_v30 = vpack.c.bf16 %v1473_v27, %v1473_v27  ;;  %v1507_v51 = vsel %vm575_vm3, %v1482_v44, 0  ;;  %v1484_v4 = vpack.c.bf16 %v1481_v62, %v1481_v62 }
  0xaa   : > { %v3808_v36 = vpop.permute.xlu0 %3452  ;;  %v1642_v42 = vpop.permute.xlu1 %1641  ;;  %v1513_v11 = vsel %vm575_vm3, %v1484_v4, 0 }
  0xab   : > { %v3455_v14 = vunpack.i.h.bf16 %v3808_v36 }
  0xac   : > { %3051 = vmatmul.mubr.msk.bf16.vlgmr.msra.gmra.mxu1 %vm568_vm0, %v3684_v7  ;;  %3306 = vmatmul.mubr.msk.bf16.vlgmr.msra.gmra.mxu0 %vm568_vm0, %v3776_v18  ;;  %v3471_v7 = vld [vmem:[%s4309_s2 + $0x40] sm:$0xff]  }
  0xad   : > { %3298 = vmatpush3.bf16.msra.mxu1 %v861_v21  ;;  %754 = vmatprep.mubr.bf16.mxu1 %v4323_v3 }
  0xae   : > { %3072 = vmatprep.subr.msk.bf16.mxu1 %vm575_vm3, %v994_v22  ;;  %1202 = vmatpush1.bf16.msra.mxu0 %v1179_v23  ;;  %v3827_v45 = vpop.permute.xlu0 %1631  ;;  %v3458_v48 = vpop.permute.xlu1 %3457 }
  0xaf   : > { %1219 = vmatprep.mubr.bf16.mxu0 %v4323_v3  ;;  %3388 = vmatprep.subr.msk.bf16.mxu0 %vm575_vm3, %v1320_v24  ;;  %v3460_v53 = vunpack.i.h.bf16 %v3458_v48  ;;  %v3459_v1 = vunpack.i.l.bf16 %v3458_v48  ;;  %v1636_v16 = vsel %vm1635_vm12, %v3455_v14, %v3827_v45  ;;  %v4325_v24 = vmov 0.0  }
  0xb1   : > { %v1800_v6 = vsel %vm1799_vm10, %v3459_v1, %v3460_v53 }
  0xb2   : > { %v1798_v54 = vpop.permute.xlu0 %1797  ;;  %v1810_v9 = vpack.c.bf16 %v1800_v6, %v1800_v6 }
  0xb3   : > { %v1801_v57 = vsel %vm1799_vm10, %v3460_v53, %v1798_v54 }
  0xb4   : > { %3052 = vmatmul.mubr.msk.bf16.gmra.mxu1 %vm568_vm0, %v3715_v40  ;;  %3084 = vmatmul.mubr.msk.bf16.vlgmr.msra.gmra.mxu0 %vm568_vm0, %v3471_v7  ;;  %v3454_v40 = vunpack.i.l.bf16 %v3808_v36  ;;  %v1811_v60 = vpack.c.bf16 %v1801_v57, %v1801_v57 }
  0xb5   : > { %3299 = vmatprep.mubr.msk.bf16.mxu1 %vm568_vm0, %v3467_v58  ;;  %1229 = vmatprep.mubr.bf16.mxu0 %v4323_v3  ;;  %v1308_v58 = vsel %vm1307_vm8, %v3445_v55, %v3771_v17  ;;  %v1806_v17 = vpop.permute.xlu1 %1805 }
  0xb6   : > { %3316 = vmatpush3.bf16.msra.mxu0 %v1349_v29  ;;  %v1645_v47 = vsel %vm1644_vm9, %v3454_v40, %v1642_v42  ;;  %v1318_v61 = vpack.c.bf16 %v1308_v58, %v1308_v58  ;;  %v1809_v19 = vsel %vm1808_vm13, %v1798_v54, %v1806_v17 }
  0xb7   : > { %3105 = vmatprep.subr.msk.bf16.mxu0 %vm575_vm3, %v1483_v30  ;;  %v1648_v52 = vpack.c.bf16 %v1645_v47, %v1645_v47  ;;  %v1812_v22 = vpack.c.bf16 %v1809_v19, %v1809_v19 }
  0xb8   : > { %v1343_v2 = vsel %vm575_vm3, %v1318_v61, 0 }
  0xb9   : > { %v1677_v59 = vsel %vm575_vm3, %v1648_v52, 0  ;;  %v1841_v23 = vsel %vm575_vm3, %v1812_v22, 0 }
  0xbc   : > { %3300 = vmatmul.mubr.msk.bf16.vlgmr.msra.gmra.mxu1 %vm568_vm0, %v3468_v8  ;;  %3085 = vmatmul.mubr.msk.bf16.gmra.mxu0 %vm568_vm0, %v3473_v33  ;;  %v1637_v8 = vsel %vm1635_vm12, %v3827_v45, %v3454_v40 }
  0xbd   : > { %1041 = vmatpush1.bf16.msra.mxu1 %v1018_v37  ;;  %1058 = vmatprep.mubr.bf16.mxu1 %v4323_v3  ;;  %v1647_v12 = vpack.c.bf16 %v1637_v8, %v1637_v8 }
  0xbe   : > { %3387 = vmatprep.subr.msk.bf16.mxu1 %vm575_vm3, %v1170_v38  ;;  %3317 = vmatprep.mubr.msk.bf16.mxu0 %vm568_vm0, %v3815_v39 }
  0xc4   : > { %3073 = vmatmul.mubr.msk.bf16.vlgmr.msra.gmra.mxu1 %vm568_vm0, %v3761_v13  ;;  %3318 = vmatmul.mubr.msk.bf16.vlgmr.msra.gmra.mxu0 %vm568_vm0, %v3832_v46  ;;  %v1835_v13 = vsel %vm575_vm3, %v1810_v9, 0 }
  0xc5   : > { %1068 = vmatprep.mubr.bf16.mxu1 %v4323_v3  ;;  %3310 = vmatpush3.bf16.msra.mxu1 %v1185_v50 }
  0xc6   : > { %3094 = vmatprep.subr.msk.bf16.mxu1 %vm575_vm3, %v1319_v49  ;;  %1530 = vmatpush1.bf16.msra.mxu0 %v1507_v51 }
  0xc7   : > { %1547 = vmatprep.mubr.bf16.mxu0 %v4323_v3  ;;  %3390 = vmatprep.subr.msk.bf16.mxu0 %vm575_vm3, %v1648_v52 }
  0xcc   : > { %3074 = vmatmul.mubr.msk.bf16.gmra.mxu1 %vm568_vm0, %v3776_v18  ;;  %3106 = vmatmul.mubr.msk.bf16.vlgmr.msra.gmra.mxu0 %vm568_vm0, %v3476_v56  ;;  %v1646_v18 = vpack.c.bf16 %v1636_v16, %v1636_v16 }
  0xcd   : > { %3311 = vmatprep.mubr.msk.bf16.mxu1 %vm568_vm0, %v3471_v7  ;;  %1557 = vmatprep.mubr.bf16.mxu0 %v4323_v3 }
  0xce   : > { %3328 = vmatpush3.bf16.msra.mxu0 %v1677_v59  ;;  %v1671_v21 = vsel %vm575_vm3, %v1646_v18, 0 }
  0xcf   : > { %3127 = vmatprep.subr.msk.bf16.mxu0 %vm575_vm3, %v1811_v60 }
  0xd4   : > { %3312 = vmatmul.mubr.msk.bf16.vlgmr.msra.gmra.mxu1 %vm568_vm0, %v3473_v33  ;;  %3107 = vmatmul.mubr.msk.bf16.gmra.mxu0 %vm568_vm0, %v3477_v63 }
  0xd5   : > { %1366 = vmatpush1.bf16.msra.mxu1 %v1343_v2  ;;  %1383 = vmatprep.mubr.bf16.mxu1 %v4323_v3 }
  0xd6   : > { %3389 = vmatprep.subr.msk.bf16.mxu1 %vm575_vm3, %v1484_v4  ;;  %3329 = vmatprep.mubr.msk.bf16.mxu0 %vm568_vm0, %v3478_v5 }
  0xdc   : > { %3095 = vmatmul.mubr.msk.bf16.vlgmr.msra.gmra.mxu1 %vm568_vm0, %v3815_v39  ;;  %3330 = vmatmul.mubr.msk.bf16.vlgmr.msra.gmra.mxu0 %vm568_vm0, %v3479_v10 }
  0xdd   : > { %3322 = vmatpush3.bf16.msra.mxu1 %v1513_v11  ;;  %1393 = vmatprep.mubr.bf16.mxu1 %v4323_v3 }
  0xde   : > { %3116 = vmatprep.subr.msk.bf16.mxu1 %vm575_vm3, %v1647_v12  ;;  %1858 = vmatpush1.bf16.msra.mxu0 %v1835_v13 }
  0xdf   : > { %1875 = vmatprep.mubr.bf16.mxu0 %v4323_v3  ;;  %3339 = vmatprep.subr.bf16.mxu0 %v4325_v24 }
  0xe4   : > { %3096 = vmatmul.mubr.msk.bf16.gmra.mxu1 %vm568_vm0, %v3832_v46  ;;  %3128 = vmatmul.mubr.msk.bf16.vlgmr.msra.gmra.mxu0 %vm568_vm0, %v3480_v15 }
  0xe5   : > { %3323 = vmatprep.mubr.msk.bf16.mxu1 %vm568_vm0, %v3476_v56  ;;  %1885 = vmatprep.mubr.bf16.mxu0 %v4323_v3 }
  0xec   : > { %3324 = vmatmul.mubr.msk.bf16.vlgmr.msra.gmra.mxu1 %vm568_vm0, %v3477_v63  ;;  %3129 = vmatmul.mubr.msk.bf16.gmra.mxu0 %vm568_vm0, %v3481_v20 }
  0xed   : > { %1694 = vmatpush1.bf16.msra.mxu1 %v1671_v21  ;;  %1711 = vmatprep.mubr.bf16.mxu1 %v4323_v3 }
  0xee   : > { %3391 = vmatprep.subr.msk.bf16.mxu1 %vm575_vm3, %v1812_v22  ;;  %3343 = vmatprep.mubr.msk.bf16.mxu0 %vm3579_vm14, %v4325_v24 }
  0xf4   : > { %3117 = vmatmul.mubr.msk.bf16.vlgmr.msra.gmra.mxu1 %vm568_vm0, %v3478_v5 }
  0xf5   : > { %3334 = vmatpush3.bf16.msra.mxu1 %v1841_v23  ;;  %1721 = vmatprep.mubr.bf16.mxu1 %v4323_v3 }
  0xfc   : > { %3118 = vmatmul.mubr.msk.bf16.gmra.mxu1 %vm568_vm0, %v3479_v10 }
  0xfd   : > { %3335 = vmatprep.mubr.msk.bf16.mxu1 %vm568_vm0, %v3480_v15 }
 0x104   : > { %3336 = vmatmul.mubr.msk.bf16.vlgmr.msra.gmra.mxu1 %vm568_vm0, %v3481_v20  ;;  %vm2157_vm0 = vcmask 556032  }
 0x105   : > { %2054 = vmatprep.mubr.bf16.mxu1 %v4323_v3 }
 0x154   : > { %v619_v25 = vpop.f32.mrf.mxu1  ;;  %v3295_v26 = vpop.f32.mrf.mxu0 }
 0x156   : > { %v621_v7 = vpop.f32.mrf.mxu1  ;;  %v799_v27 = vpop.f32.mrf.mxu0 }
 0x158   : > { %v623_v28 = vpop.f32.mrf.mxu1  ;;  %v3296_v29 = vpop.f32.mrf.mxu0 }
 0x15a   : > { %v625_v30 = vpop.f32.mrf.mxu1  ;;  %v802_v31 = vpop.f32.mrf.mxu0 }
 0x15c   : > { %v629_v32 = vpop.f32.mrf.mxu1  ;;  %v897_v33 = vpop.f32.mrf.mxu0 }
 0x15e   : > { %v631_v34 = vpop.f32.mrf.mxu1  ;;  %v899_v35 = vpop.f32.mrf.mxu0 }
 0x160   : > { %v3914_v36 = vpop.f32.mrf.mxu1  ;;  %v901_v37 = vpop.f32.mrf.mxu0 }
 0x162   : > { %v3916_v38 = vpop.f32.mrf.mxu1  ;;  %v903_v39 = vpop.f32.mrf.mxu0 }
 0x164   : > { %v3289_v0 = vpop.f32.mrf.mxu1  ;;  %v907_v40 = vpop.f32.mrf.mxu0 }
 0x165   : > { %v808_v42 = vadd.f32 %v3295_v26, %v3289_v0 }
 0x166   : > { %v672_v43 = vpop.f32.mrf.mxu1  ;;  %v909_v44 = vpop.f32.mrf.mxu0 }
 0x167   : > { %v800_v45 = vadd.f32 %v799_v27, %v672_v43 }
 0x168   : > { %v3290_v46 = vpop.f32.mrf.mxu1  ;;  %v3918_v47 = vpop.f32.mrf.mxu0 }
 0x169   : > { %v3920_v48 = vadd.f32 %v3296_v29, %v3290_v46 }
 0x16a   : > { %v675_v49 = vpop.f32.mrf.mxu1  ;;  %v3922_v50 = vpop.f32.mrf.mxu0 }
 0x16b   : > { %v3924_v51 = vadd.f32 %v802_v31, %v675_v49 }
 0x16c   : > { %v746_v52 = vpop.f32.mrf.mxu1  ;;  %v3307_v53 = vpop.f32.mrf.mxu0 }
 0x16d   : > { %v747_v54 = vadd.f32 %v746_v52, %v619_v25 }
 0x16e   : > { %v748_v55 = vpop.f32.mrf.mxu1  ;;  %v1113_v56 = vpop.f32.mrf.mxu0 }
 0x16f   : > { %v749_v57 = vadd.f32 %v748_v55, %v621_v7  ;;  %v3926_v58 = vadd.f32 %v897_v33, %v747_v54 }
 0x170   : > { %v750_v59 = vpop.f32.mrf.mxu1  ;;  %v3928_v60 = vpop.f32.mrf.mxu0 }
 0x171   : > { %v751_v61 = vadd.f32 %v750_v59, %v623_v28  ;;  %v3930_v62 = vadd.f32 %v899_v35, %v749_v57 }
 0x172   : > { %v752_v63 = vpop.f32.mrf.mxu1  ;;  %v3932_v1 = vpop.f32.mrf.mxu0 }
 0x173   : > { %v753_v2 = vadd.f32 %v752_v63, %v625_v30  ;;  %v3934_v4 = vadd.f32 %v901_v37, %v751_v61 }
 0x174   : > { %v756_v5 = vpop.f32.mrf.mxu1  ;;  %v3936_v6 = vpop.f32.mrf.mxu0 }
 0x175   : > { %v757_v8 = vadd.f32 %v756_v5, %v629_v32  ;;  %v3938_v9 = vadd.f32 %v903_v39, %v753_v2 }
 0x176   : > { %v758_v10 = vpop.f32.mrf.mxu1  ;;  %v3940_v11 = vpop.f32.mrf.mxu0 }
 0x177   : > { %v759_v12 = vadd.f32 %v758_v10, %v631_v34  ;;  %v3942_v13 = vadd.f32 %v907_v40, %v757_v8 }
 0x178   : > { %v760_v14 = vpop.f32.mrf.mxu1  ;;  %v3944_v15 = vpop.f32.mrf.mxu0 }
 0x179   : > { %v3946_v16 = vadd.f32 %v909_v44, %v759_v12 }
 0x17a   : > { %v762_v17 = vpop.f32.mrf.mxu1  ;;  %v3948_v18 = vpop.f32.mrf.mxu0 }
 0x17c   : > { %v3301_v19 = vpop.f32.mrf.mxu1  ;;  %v3950_v20 = vpop.f32.mrf.mxu0 }
 0x17d   : > { %v973_v21 = vadd.f32 %v3301_v19, %v808_v42 }
 0x17e   : > { %v950_v22 = vpop.f32.mrf.mxu1  ;;  %v3952_v23 = vpop.f32.mrf.mxu0 }
 0x17f   : > { %v967_v25 = vadd.f32 %v950_v22, %v800_v45  ;;  %v3954_v26 = vadd.f32 %v3307_v53, %v973_v21 }
 0x180   : > { %v3956_v7 = vpop.f32.mrf.mxu1  ;;  %v3958_v27 = vpop.f32.mrf.mxu0 }
 0x181   : > { %v3960_v28 = vadd.f32 %v1113_v56, %v967_v25 }
 0x182   : > { %v3962_v29 = vpop.f32.mrf.mxu1  ;;  %v3964_v30 = vpop.f32.mrf.mxu0 }
 0x184   : > { %v1060_v31 = vpop.f32.mrf.mxu1  ;;  %v3966_v32 = vpop.f32.mrf.mxu0 }
 0x186   : > { %v1062_v33 = vpop.f32.mrf.mxu1  ;;  %v3968_v34 = vpop.f32.mrf.mxu0 }
 0x187   : > { %4330 = vst [vmem:[#allocation3_spill] sm:$0xff] %v3968_v34 }
 0x188   : > { %v1064_v35 = vpop.f32.mrf.mxu1  ;;  %v3970_v37 = vpop.f32.mrf.mxu0 }
 0x189   : > { %4331 = vst [vmem:[#allocation4_spill] sm:$0xff] %v3970_v37 }
 0x18a   : > { %v1066_v39 = vpop.f32.mrf.mxu1  ;;  %v3972_v0 = vpop.f32.mrf.mxu0 }
 0x18b   : > { %4332 = vst [vmem:[#allocation5_spill] sm:$0xff] %v3972_v0  ;;  %v1128_v0 = vadd.f32 %v1060_v31, %v3926_v58  ;;  %v763_v31 = vadd.f32 %v762_v17, %v3916_v38  ;;  %v4025_v17 = vpop.permute.xlu0 %1973 }
 0x18c   : > { %v1070_v40 = vpop.f32.mrf.mxu1  ;;  %v1549_v42 = vpop.f32.mrf.mxu0 }
 0x18e   : > { %v1072_v43 = vpop.f32.mrf.mxu1  ;;  %v1551_v44 = vpop.f32.mrf.mxu0 }
 0x190   : > { %v1074_v45 = vpop.f32.mrf.mxu1  ;;  %v1553_v46 = vpop.f32.mrf.mxu0 }
 0x192   : > { %v1076_v49 = vpop.f32.mrf.mxu1  ;;  %v3974_v52 = vpop.f32.mrf.mxu0 }
 0x194   : > { %v3976_v53 = vpop.f32.mrf.mxu1  ;;  %v3978_v54 = vpop.f32.mrf.mxu0 }
 0x196   : > { %v3980_v55 = vpop.f32.mrf.mxu1  ;;  %v3982_v56 = vpop.f32.mrf.mxu0 }
 0x197   : > { %4333 = vst [vmem:[#allocation6_spill] sm:$0xff] %v3982_v56  ;;  %v1132_v56 = vadd.f32 %v1066_v39, %v3938_v9  ;;  %v975_v39 = vadd.f32 %v3922_v50, %v763_v31 }
 0x198   : > { %v3984_v57 = vpop.f32.mrf.mxu1  ;;  %v3986_v59 = vpop.f32.mrf.mxu0 }
 0x199   : > { %4334 = vst [vmem:[#allocation7_spill] sm:$0xff] %v3986_v59  ;;  %v1293_v9 = vadd.f32 %v3948_v18, %v1132_v56  ;;  %v970_v18 = vadd.f32 %v3962_v29, %v3924_v51  ;;  %v1138_v56 = vadd.f32 %v1076_v49, %v975_v39 }
 0x19a   : > { %v3988_v61 = vpop.f32.mrf.mxu1  ;;  %v3990_v63 = vpop.f32.mrf.mxu0 }
 0x19b   : > { %4335 = vst [vmem:[#allocation8_spill] sm:$0xff] %v3988_v61  ;;  %4336 = vst [vmem:[#allocation9_spill] sm:$0xff] %v3990_v63  ;;  %v1129_v63 = vadd.f32 %v1062_v33, %v3930_v62  ;;  %v761_v61 = vadd.f32 %v760_v14, %v3914_v36  ;;  %v1135_v14 = vadd.f32 %v1072_v43, %v3946_v16 }
 0x19c   : > { %v1385_v2 = vpop.f32.mrf.mxu1  ;;  %v3992_v5 = vpop.f32.mrf.mxu0 }
 0x19d   : > { %4337 = vst [vmem:[#allocation10_spill] sm:$0xff] %v3992_v5  ;;  %v974_v36 = vadd.f32 %v3918_v47, %v761_v61 }
 0x19e   : > { %v1387_v8 = vpop.f32.mrf.mxu1  ;;  %v3994_v10 = vpop.f32.mrf.mxu0 }
 0x19f   : > { %4338 = vst [vmem:[#allocation11_spill] sm:$0xff] %v3994_v10  ;;  %v1289_v10 = vadd.f32 %v3936_v6, %v1128_v0  ;;  %v1134_v6 = vadd.f32 %v1070_v40, %v3942_v13  ;;  %v976_v13 = vadd.f32 %v3956_v7, %v3920_v48 }
 0x1a0   : > { %v1389_v12 = vpop.f32.mrf.mxu1  ;;  %v3996_v19 = vpop.f32.mrf.mxu0 }
 0x1a1   : > { %4339 = vst [vmem:[#allocation12_spill] sm:$0xff] %v3996_v19  ;;  %v1131_v19 = vadd.f32 %v1064_v35, %v3934_v4  ;;  %v1453_v58 = vadd.f32 %v1385_v2, %v1289_v10  ;;  %v4018_v4 = vpop.permute.xlu1 %1978  ;;  %v1295_v47 = vadd.f32 %v3950_v20, %v1134_v6  ;;  %v1297_v20 = vadd.f32 %v3976_v53, %v3954_v26 }
 0x1a2   : > { %v1391_v21 = vpop.f32.mrf.mxu1  ;;  %v3998_v25 = vpop.f32.mrf.mxu0  ;;  %v1139_v51 = vadd.f32 %v3928_v60, %v976_v13 }
 0x1a3   : > { %4340 = vst [vmem:[#allocation13_spill] sm:$0xff] %v3998_v25  ;;  %v1290_v25 = vadd.f32 %v3940_v11, %v1129_v63  ;;  %v1292_v33 = vadd.f32 %v3944_v15, %v1131_v19  ;;  %v1617_v35 = vadd.f32 %v1549_v42, %v1453_v58  ;;  %v1137_v15 = vadd.f32 %v1074_v45, %v974_v36  ;;  %v4344_v36 = vld [vmem:[#allocation3_spill] sm:$0xff] }
 0x1a4   : > { %v1395_v22 = vpop.f32.mrf.mxu1  ;;  %v1877_v41 = vpop.f32.mrf.mxu0  ;;  %v1457_v16 = vadd.f32 %v1391_v21, %v1293_v9  ;;  %v1296_v42 = vadd.f32 %v3952_v23, %v1135_v14  ;;  %v4345_v14 = vld [vmem:[#allocation8_spill] sm:$0xff]  ;;  %v4346_v9 = vld [vmem:[#allocation7_spill] sm:$0xff] }
 0x1a5   : > { %v1454_v0 = vadd.f32 %v1387_v8, %v1290_v25  ;;  %v1456_v38 = vadd.f32 %v1389_v12, %v1292_v33  ;;  %v1459_v50 = vadd.f32 %v1395_v22, %v1295_v47  ;;  %v4034_v48 = vpop.permute.xlu1 %1963  ;;  %v1298_v7 = vadd.f32 %v3958_v27, %v1137_v15  ;;  %v4045_v25 = vpop.permute.xlu0 %1968 }
 0x1a6   : > { %v1397_v3 = vpop.f32.mrf.mxu1  ;;  %v1879_v59 = vpop.f32.mrf.mxu0  ;;  %v1621_v23 = vadd.f32 %v3974_v52, %v1457_v16  ;;  %v1461_v52 = vadd.f32 %v3966_v32, %v1297_v20 }
 0x1a7   : > { %v1618_v61 = vadd.f32 %v1551_v44, %v1454_v0  ;;  %v1620_v8 = vadd.f32 %v1553_v46, %v1456_v38  ;;  %v1460_v44 = vadd.f32 %v1397_v3, %v1296_v42  ;;  %v1299_v46 = vadd.f32 %v3964_v30, %v1138_v56  ;;  %v4342_v30 = vld [vmem:[#allocation6_spill] sm:$0xff] }
 0x1a8   : > { %v1399_v24 = vpop.f32.mrf.mxu1  ;;  %v1881_v62 = vpop.f32.mrf.mxu0  ;;  %v1133_v3 = vadd.f32 %v3932_v1, %v970_v18  ;;  %v1623_v26 = vadd.f32 %v3978_v54, %v1459_v50 }
 0x1a9   : > { %v1462_v21 = vadd.f32 %v1399_v24, %v1298_v7  ;;  %v1624_v58 = vadd.f32 %v4342_v30, %v1460_v44 }
 0x1aa   : > { %v4001_v37 = vpop.f32.mrf.mxu1  ;;  %v1883_v63 = vpop.f32.mrf.mxu0 }
 0x1ab   : > { %4341 = vst [vmem:[#allocation14_spill] sm:$0xff] %v4001_v37  ;;  %v1626_v32 = vadd.f32 %v4346_v9, %v1462_v21 }
 0x1ac   : > { %v4004_v5 = vpop.f32.mrf.mxu1  ;;  %v1887_v19 = vpop.f32.mrf.mxu0 }
 0x1ae   : > { %v4009_v34 = vpop.f32.mrf.mxu1 }
 0x1b0   : > { %v4014_v37 = vpop.f32.mrf.mxu1 }
 0x1b2   : > { %v4022_v11 = vpop.f32.mrf.mxu1  ;;  %v4343_v31 = vld [vmem:[#allocation14_spill] sm:$0xff] }
 0x1b4   : > { %v1713_v40 = vpop.f32.mrf.mxu1 }
 0x1b5   : > { %v1781_v43 = vadd.f32 %v1713_v40, %v1617_v35  ;;  %v4347_v40 = vld [vmem:[#allocation9_spill] sm:$0xff] }
 0x1b6   : > { %v1715_v2 = vpop.f32.mrf.mxu1 }
 0x1b7   : > { %v1782_v10 = vadd.f32 %v1715_v2, %v1618_v61  ;;  %v1945_v12 = vadd.f32 %v1877_v41, %v1781_v43  ;;  %v1291_v41 = vadd.f32 %v3980_v55, %v3960_v28  ;;  %v1463_v28 = vadd.f32 %v4343_v31, %v1299_v46  ;;  %v1889_v55 = vpop.f32.mrf.mxu0 }
 0x1b8   : > { %v1717_v45 = vpop.f32.mrf.mxu1  ;;  %v1625_v61 = vadd.f32 %v4004_v5, %v1461_v52 }
 0x1b9   : > { %v1784_v29 = vadd.f32 %v1717_v45, %v1620_v8  ;;  %v1946_v49 = vadd.f32 %v1879_v59, %v1782_v10  ;;  %v1981_v27 = vadd.f32 %v4034_v48, %v1945_v12  ;;  %v1300_v59 = vadd.f32 %v3984_v57, %v1139_v51  ;;  %v1891_v43 = vpop.f32.mrf.mxu0  ;;  %v4348_v8 = vld [vmem:[#allocation4_spill] sm:$0xff]  ;;  %v4349_v10 = vld [vmem:[#allocation5_spill] sm:$0xff]  ;;  %v4350_v51 = vld [vmem:[#allocation10_spill] sm:$0xff] }
 0x1ba   : > { %v1719_v22 = vpop.f32.mrf.mxu1  ;;  %v1455_v54 = vadd.f32 %v4344_v36, %v1291_v41  ;;  %v1627_v47 = vadd.f32 %v4347_v40, %v1463_v28  ;;  %v4353_v28 = vld [vmem:[#allocation13_spill] sm:$0xff]  ;;  %v2016_v40 = vpop.permute.xlu1 %2015 }
 0x1bb   : > { %v1785_v60 = vadd.f32 %v1719_v22, %v1621_v23  ;;  %v1948_v53 = vadd.f32 %v1881_v62, %v1784_v29  ;;  %v1982_v33 = vadd.f32 %v4034_v48, %v1946_v49  ;;  %v1294_v62 = vadd.f32 %v4345_v14, %v1133_v3  ;;  %v4351_v29 = vld [vmem:[#allocation11_spill] sm:$0xff]  ;;  %v1893_v46 = vpop.f32.mrf.mxu0 }
 0x1bc   : > { %v1723_v24 = vpop.f32.mrf.mxu1  ;;  %v1993_v35 = vmax.f32 %v1981_v27, 0.0  ;;  %v1619_v16 = vadd.f32 %v4009_v34, %v1455_v54  ;;  %v1464_v50 = vadd.f32 %v4348_v8, %v1300_v59  ;;  %v1789_v34 = vadd.f32 %v4350_v51, %v1625_v61 }
 0x1bd   : > { %v1984_v6 = vadd.f32 %v4045_v25, %v1948_v53  ;;  %v1787_v0 = vadd.f32 %v1723_v24, %v1623_v26  ;;  %v1949_v1 = vadd.f32 %v1883_v63, %v1785_v60  ;;  %v1994_v18 = vmax.f32 %v1982_v33, 0.0 }
 0x1be   : > { %v1725_v57 = vpop.f32.mrf.mxu1  ;;  %v1458_v12 = vadd.f32 %v4349_v10, %v1294_v62  ;;  %v1628_v23 = vadd.f32 %v4014_v37, %v1464_v50  ;;  %v1783_v49 = vadd.f32 %v4351_v29, %v1619_v16  ;;  %v2121_v29 = vld [vmem:[%s4308_s1] sm:$0x7] }
 0x1bf   : > { %v1996_v38 = vmax.f32 %v1984_v6, 0.0  ;;  %v1985_v39 = vadd.f32 %v4045_v25, %v1949_v1  ;;  %v1788_v13 = vadd.f32 %v1725_v57, %v1624_v58  ;;  %v1951_v15 = vadd.f32 %v1887_v19, %v1787_v0  ;;  %v4352_v58 = vld [vmem:[#allocation12_spill] sm:$0xff] }
 0x1c0   : > { %v1727_v63 = vpop.f32.mrf.mxu1  ;;  %v1622_v21 = vadd.f32 %v4022_v11, %v1458_v12  ;;  %v1792_v37 = vadd.f32 %v4352_v58, %v1628_v23 }
 0x1c1   : > { %v4062_v42 = vpack.c.bf16 %v1996_v38, %v1993_v35  ;;  %v1997_v56 = vmax.f32 %v1985_v39, 0.0  ;;  %v1790_v2 = vadd.f32 %v1727_v63, %v1626_v32  ;;  %v1952_v7 = vadd.f32 %v1889_v55, %v1788_v13 }
 0x1c2   : > { %v1729_v20 = vpop.f32.mrf.mxu1  ;;  %v1987_v44 = vadd.f32 %v4025_v17, %v1951_v15  ;;  %v1786_v24 = vadd.f32 %v4353_v28, %v1622_v21  ;;  %v3484_v15 = vld [vmem:[%s4315_s8 + $0x24] ss:$16 sps:$4 sm:$0xff]  }
 0x1c3   : > { %v1791_v45 = vadd.f32 %v1729_v20, %v1627_v47  ;;  %v1954_v19 = vadd.f32 %v1891_v43, %v1790_v2  ;;  %v2006_v5 = vpack.c.bf16 %v1997_v56, %v1994_v18  ;;  %v1988_v27 = vadd.f32 %v4025_v17, %v1952_v7 }
 0x1c4   : > { %v3337_v41 = vpop.f32.mrf.mxu1  ;;  %v1999_v53 = vmax.f32 %v1987_v44, 0.0 }
 0x1c5   : > { %v1990_v22 = vadd.f32 %v4018_v4, %v1954_v19  ;;  %v1955_v3 = vadd.f32 %v1893_v46, %v1791_v45  ;;  %v1953_v26 = vadd.f32 %v3337_v41, %v1789_v34  ;;  %v2000_v55 = vmax.f32 %v1988_v27, 0.0  ;;  %v4355_v34 = vld [vmem:[#allocation2_spill] sm:$0xff] }
 0x1c6   : > { %v1930_v60 = vpop.f32.mrf.mxu1  ;;  %v2125_v23 = vsub.s32 0, %v4355_v34  ;;  %v2133_v46 = vsub.s32 2, %v4355_v34 }
 0x1c7   : > { %v2002_v52 = vmax.f32 %v1990_v22, 0.0  ;;  %v1991_v59 = vadd.f32 %v4018_v4, %v1955_v3  ;;  %v1947_v30 = vadd.f32 %v1930_v60, %v1783_v49  ;;  %v1989_v6 = vadd.f32 %v4025_v17, %v1953_v26  ;;  %v2011_v17 = vld [vmem:[%s4311_s4] sm:$0x3] }
 0x1c8   : > { %v3338_v31 = vpop.f32.mrf.mxu1  ;;  %v2129_v49 = vsub.s32 1, %v4355_v34  ;;  %v2126_v41 = vrot.slane %v2121_v29, %v2125_v23  ;;  %v2134_v22 = vrot.slane %v2121_v29, %v2133_v46 }
 0x1c9   : > { %v2008_v33 = vpack.c.bf16 %v2002_v52, %v1999_v53  ;;  %v2003_v11 = vmax.f32 %v1991_v59, 0.0  ;;  %v1956_v0 = vadd.f32 %v3338_v31, %v1792_v37  ;;  %v1983_v36 = vadd.f32 %v4034_v48, %v1947_v30 }
 0x1ca   : > { %v1933_v1 = vpop.f32.mrf.mxu1  ;;  %v2001_v32 = vmax.f32 %v1989_v6, 0.0  ;;  %v2130_v21 = vrot.slane %v2121_v29, %v2129_v49  ;;  %v4356_v6 = vmov 0   ;;  %v3514_v29 = vld [vmem:[%s4317_s10 + $0x10] sm:$0xff]  }
 0x1cb   : > { %v1950_v54 = vadd.f32 %v1933_v1, %v1786_v24  ;;  %v2009_v14 = vpack.c.bf16 %v2003_v11, %v2000_v55  ;;  %v1992_v62 = vadd.f32 %v4018_v4, %v1956_v0  ;;  %v1995_v57 = vmax.f32 %v1983_v36, 0.0  ;;  %v3485_v0 = vld [vmem:[%s4313_s6 + $0x8] sm:$0xff]   ;;  %v3488_v1 = vld [vmem:[%s4315_s8 + $0x4] ss:$16 sps:$4 sm:$0xff]   ;;  %v3486_v36 = vld [vmem:[%s4315_s8] ss:$16 sps:$4 sm:$0xff]  }
 0x1cc   : > { %v4354_v4 = vmov 0.0  }
 0x1cd   : > { %v1986_v9 = vadd.f32 %v4045_v25, %v1950_v54  ;;  %2034 = vmatprep.subr.bf16.mxu1 %v2009_v14  ;;  %v2004_v35 = vmax.f32 %v1992_v62, 0.0  ;;  %v3489_v54 = vld [vmem:[%s4313_s6] sm:$0xff]   ;;  %v3496_v62 = vld [vmem:[%s4317_s10 + $0x78] sm:$0xff]  }
 0x1ce   : > { %2035 = vmatpush1.bf16.msra.mxu1 %v2008_v33 }
 0x1cf   : > { %v1998_v38 = vmax.f32 %v1986_v9, 0.0  ;;  %2036 = vmatprep.subr.bf16.mxu1 %v2006_v5  ;;  %v2010_v39 = vpack.c.bf16 %v2004_v35, %v2001_v32 }
 0x1d1   : > { %v2007_v13 = vpack.c.bf16 %v1998_v38, %v1995_v57  ;;  %3340 = vmatpush3.bf16.msra.mxu0 %v2010_v39  ;;  %v2165_v48 = vsel %vm2157_vm0, %v2010_v39, 0 }
 0x1d2   : > { %2037 = vmatpush1.bf16.msra.mxu1 %v4062_v42  ;;  %3341 = vmatprep.subr.bf16.mxu0 %v4354_v4 }
 0x1d3   : > { %2179 = vmatprep.subr.bf16.mxu1 %v2009_v14  ;;  %v2162_v25 = vsel %vm2157_vm0, %v2007_v13, 0  ;;  %v3492_v14 = vld [vmem:[%s4315_s8 + $0x2c] ss:$16 sps:$4 sm:$0xff]  }
 0x1d5   : > { %3132 = vmatmul.mubr.msk.bf16.vlgmr.msra.gmra.mxu1 %vm2018_vm15, %v2011_v17  ;;  %3342 = vmatpush3.bf16.msra.mxu0 %v2007_v13 }
 0x1d6   : > { %2180 = vmatpush1.bf16.xpose.msra.mxu1 %v2008_v33  ;;  %3347 = vmatprep.subr.bf16.mxu0 %v4354_v4  ;;  %v3482_v33 = vld [vmem:[%s4315_s8 + $0x20] ss:$16 sps:$4 sm:$0xff]  }
 0x1d7   : > { %2181 = vmatprep.subr.bf16.mxu1 %v2006_v5 }
 0x1d8   : > { %3344 = vmatmul.mubr.msk.bf16.vlgmr.msra.gmra.mxu0 %vm2018_vm15, %v2011_v17 }
 0x1d9   : > { %3348 = vmatpush3.bf16.xpose.msra.mxu0 %v2165_v48  ;;  %3351 = vmatprep.mubr.msk.bf16.mxu0 %vm3579_vm14, %v4354_v4  ;;  %v3490_v48 = vld [vmem:[%s4315_s8 + $0x28] ss:$16 sps:$4 sm:$0xff]  }
 0x1da   : > { %3349 = vmatprep.subr.bf16.mxu0 %v4354_v4 }
 0x1de   : > { %2182 = vmatpush1.bf16.xpose.msra.mxu1 %v4062_v42 }
 0x1df   : > { %3355 = vmatprep.subr.bf16.mxu1 %v4354_v4 }
 0x1e1   : > { %3350 = vmatpush3.bf16.xpose.msra.mxu0 %v2162_v25 }
 0x1e2   : > { %2410 = vmatprep.subr.bf16.mxu0 %v3484_v15 }
 0x295   : > { %v2056_v47 = vpop.f32.mrf.mxu1 }
 0x296   : > { %v2057_v61 = vadd.f32 %v2056_v47, %v2016_v40  ;;  %v3497_v47 = vld [vmem:[%s4317_s10 + $0x38] sm:$0xff]  }
 0x297   : > { %v2058_v16 = vpop.f32.mrf.mxu1 }
 0x298   : > { %v3134_v63 = vmul.f32 -1.442695, %v2057_v61  ;;  %v2059_v43 = vadd.f32 %v2058_v16, %v2016_v40  ;;  %v2097_v18 = vpop.f32.mrf.mxu0  ;;  %v3498_v16 = vld [vmem:[%s4317_s10 + $0x70] sm:$0xff]  }
 0x299   : > { %v2060_v56 = vpop.f32.mrf.mxu1  ;;  %v2098_v2 = vadd.f32 %v2097_v18, %v2016_v40  ;;  %v3495_v40 = vld [vmem:[%s4315_s8 + $0xc] ss:$16 sps:$4 sm:$0xff]  }
 0x29a   : > { %3536 = vpow2.f32 %v3134_v63  ;;  %v3135_v42 = vmul.f32 -1.442695, %v2059_v43  ;;  %v3345_v8 = vpop.f32.mrf.mxu0  ;;  %v3493_v63 = vld [vmem:[%s4315_s8 + $0x8] ss:$16 sps:$4 sm:$0xff]   ;;  %v3499_v43 = vld [vmem:[%s4317_s10 + $0x30] sm:$0xff]  }
 0x29b   : > { %v2061_v50 = vpop.f32.mrf.mxu1  ;;  %v3136_v10 = vmul.f32 -1.442695, %v2098_v2  ;;  %v3501_v18 = vld [vmem:[%s4317_s10 + $0xf8] sm:$0xff]   ;;  %v3500_v56 = vld [vmem:[%s4317_s10 + $0x68] sm:$0xff]   ;;  %v3505_v8 = vld [vmem:[%s4317_s10 + $0xf0] sm:$0xff]  }
 0x29c   : > { %3538 = vpow2.f32 %v3135_v42  ;;  %v2100_v12 = vpop.f32.mrf.mxu0  ;;  %v3503_v42 = vld [vmem:[%s4317_s10 + $0xb8] sm:$0xff]   ;;  %v3502_v2 = vld [vmem:[%s4317_s10 + $0x28] sm:$0xff]   ;;  %v3504_v50 = vld [vmem:[%s4317_s10 + $0x60] sm:$0xff]  }
 0x29d   : > { %3540 = vpow2.f32 %v3136_v10  ;;  %v3507_v10 = vld [vmem:[%s4317_s10 + $0xb0] sm:$0xff]   ;;  %v3506_v12 = vld [vmem:[%s4317_s10 + $0x20] sm:$0xff]  }
 0x29e   : > { %v3346_v7 = vpop.f32.mrf.mxu0 }
 0x29f   : > { %v3509_v7 = vld [vmem:[%s4317_s10 + $0xe8] sm:$0xff]  }
 0x2a7   : > { %v3537_v20 = vpop.eup %3536 }
 0x2a8   : > { %v2112_v44 = vadd.f32 1.0, %v3537_v20  ;;  %v3508_v20 = vld [vmem:[%s4317_s10 + $0x58] sm:$0xff]  }
 0x2a9   : > { %v3539_v45 = vpop.eup %3538 }
 0x2aa   : > { %3542 = vrcp.f32 %v2112_v44  ;;  %v2113_v19 = vadd.f32 1.0, %v3539_v45  ;;  %v3541_v5 = vpop.eup %3540  ;;  %v3511_v44 = vld [vmem:[%s4317_s10 + $0xa8] sm:$0xff]   ;;  %v3510_v45 = vld [vmem:[%s4317_s10 + $0x18] sm:$0xff]  }
 0x2ab   : > { %v2114_v51 = vadd.f32 1.0, %v3541_v5  ;;  %v3512_v5 = vld [vmem:[%s4317_s10 + $0x50] sm:$0xff]  }
 0x2ac   : > { %3544 = vrcp.f32 %v2113_v19  ;;  %v3513_v19 = vld [vmem:[%s4317_s10 + $0xe0] sm:$0xff]  }
 0x2ad   : > { %3546 = vrcp.f32 %v2114_v51  ;;  %v3515_v51 = vld [vmem:[%s4317_s10 + $0xa0] sm:$0xff]  }
 0x2b7   : > { %v3543_v27 = vpop.eup %3542 }
 0x2b8   : > { %v2138_v3 = vmul.f32 %v3543_v27, %v2126_v41  ;;  %v3518_v27 = vld [vmem:[%s4317_s10 + $0x8] sm:$0xff]  }
 0x2b9   : > { %v3545_v26 = vpop.eup %3544 }
 0x2ba   : > { %v2139_v60 = vmul.f32 %v3545_v26, %v2130_v21  ;;  %v2144_v53 = vrot.slane %v2138_v3, 7  ;;  %v3547_v52 = vpop.eup %3546  ;;  %v3520_v3 = vld [vmem:[%s4317_s10 + $0x40] sm:$0xff]   ;;  %v3521_v26 = vld [vmem:[%s4317_s10 + $0xd0] sm:$0xff]  }
 0x2bb   : > { %v2140_v59 = vmul.f32 %v3547_v52, %v2134_v22  ;;  %v3524_v52 = vld [vmem:[%s4317_s10 + $0xc8] sm:$0xff]  }
 0x2bc   : > { %v2145_v30 = vrot.slane %v2139_v60, 7  ;;  %v2151_v58 = vsel %vm2150_vm1, %v2126_v41, %v2144_v53  ;;  %v3516_v41 = vld [vmem:[%s4317_s10 + $0x48] sm:$0xff]   ;;  %v3522_v60 = vld [vmem:[%s4317_s10] sm:$0xff]   ;;  %v3523_v53 = vld [vmem:[%s4317_s10 + $0x90] sm:$0xff]  }
 0x2bd   : > { %v2146_v37 = vrot.slane %v2140_v59, 7  ;;  %v2154_v55 = vpack.c.bf16 %v2151_v58, %v2151_v58  ;;  %v3525_v59 = vld [vmem:[%s4317_s10 + $0x88] sm:$0xff]   ;;  %v3527_v58 = vld [vmem:[%s4317_s10 + $0x80] sm:$0xff]  }
 0x2be   : > { %v2152_v31 = vsel %vm2150_vm1, %v2130_v21, %v2145_v30  ;;  %v3517_v21 = vld [vmem:[%s4317_s10 + $0xd8] sm:$0xff]   ;;  %v3526_v30 = vld [vmem:[%s4317_s10 + $0xc0] sm:$0xff]  }
 0x2bf   : > { %v2155_v28 = vpack.c.bf16 %v2152_v31, %v2152_v31  ;;  %v2153_v24 = vsel %vm2150_vm1, %v2134_v22, %v2146_v37  ;;  %v3519_v22 = vld [vmem:[%s4317_s10 + $0x98] sm:$0xff]   ;;  %v2336_v37 = vld [vmem:[%s4316_s9] sm:$0xf] }
 0x2c0   : > { %v2156_v11 = vpack.c.bf16 %v2153_v24, %v2153_v24  ;;  %v2341_v31 = vrot.slane %v2336_v37, %v2125_v23  ;;  %v2345_v24 = vrot.slane %v2336_v37, %v2129_v49  ;;  %v2349_v49 = vrot.slane %v2336_v37, %v2133_v46 }
 0x2c1   : > { %2199 = vmatprep.mubr.bf16.mxu1 %v2155_v28  ;;  %v3138_v28 = vld [vmem:[%s4314_s7] ss:$0 sm:$0xff] }
 0x2c2   : > { %2200 = vmatmul.mubr.bf16.vlgmr.msra.gmra.mxu1 %v2154_v55  ;;  %3352 = vmatmul.mubr.msk.bf16.vlgmr.msra.gmra.mxu0 %vm2157_vm0, %v2156_v11 }
 0x2c3   : > { %3359 = vmatprep.mubr.msk.bf16.mxu1 %vm3579_vm14, %v4354_v4  ;;  %2411 = vmatpush1.bf16.msra.mxu0 %v3482_v33 }
 0x2c4   : > { %2430 = vmatprep.mubr.bf16.mxu0 %v4356_v6  ;;  %3356 = vmatpush3.bf16.msra.mxu1 %v3485_v0 }
 0x2c5   : > { %3357 = vmatprep.subr.bf16.mxu1 %v4354_v4  ;;  %2412 = vmatprep.subr.bf16.mxu0 %v3488_v1 }
 0x2c7   : > { %2413 = vmatpush1.bf16.msra.mxu0 %v3486_v36 }
 0x2c8   : > { %3358 = vmatpush3.bf16.msra.mxu1 %v3489_v54  ;;  %3232 = vmatprep.subr.bf16.mxu0 %v3496_v62 }
 0x2c9   : > { %2451 = vmatprep.subr.bf16.mxu1 %v3492_v14  ;;  %v2352_v14 = vsub.s32 3, %v4355_v34 }
 0x382   : > { %v2201_v9 = vpop.f32.mrf.mxu1  ;;  %v2241_v32 = vpop.f32.mrf.mxu0 }
 0x383   : > { %v2242_v35 = vadd.f32 %v2241_v32, %v2201_v9 }
 0x384   : > { %v2203_v57 = vpop.f32.mrf.mxu1  ;;  %v3353_v38 = vpop.f32.mrf.mxu0 }
 0x385   : > { %v2247_v39 = vmul.f32 0.00390625, %v2242_v35 }
 0x386   : > { %v2204_v13 = vpop.f32.mrf.mxu1  ;;  %v2244_v17 = vpop.f32.mrf.mxu0 }
 0x387   : > { %v2248_v25 = vpack.c.bf16 %v2247_v39, %v2247_v39  ;;  %v2353_v39 = vrot.slane %v2336_v37, %v2352_v14  ;;  %v3185_v37 = vld [vmem:[%s4320_s13] ss:$0 sm:$0xff] }
 0x388   : > { %v2205_v15 = vpop.f32.mrf.mxu1  ;;  %v3354_v61 = vpop.f32.mrf.mxu0 }
 0x389   : > { %3360 = vmatmul.mubr.msk.bf16.vlgmr.msra.gmra.mxu1 %vm2018_vm15, %v2248_v25  ;;  %3150 = vmatmul.mubr.msk.bf16.vlgmr.msra.gmra.mxu0 %vm2018_vm15, %v2248_v25 }
 0x38a   : > { %2452 = vmatpush1.bf16.msra.mxu1 %v3490_v48  ;;  %2471 = vmatprep.mubr.bf16.mxu1 %v4356_v6 }
 0x38b   : > { %2453 = vmatprep.subr.bf16.mxu1 %v3495_v40  ;;  %3233 = vmatpush3.bf16.msra.mxu0 %v3497_v47 }
 0x38c   : > { %3234 = vmatprep.subr.bf16.mxu0 %v3498_v16 }
 0x38e   : > { %2454 = vmatpush1.bf16.msra.mxu1 %v3493_v63  ;;  %v3528_v63 = vld [vmem:[%s4319_s12 + $0x38] sm:$0xff]  }
 0x38f   : > { %3235 = vmatpush3.bf16.msra.mxu0 %v3499_v43  ;;  %3254 = vmatprep.subr.bf16.mxu1 %v3501_v18  ;;  %v3529_v43 = vld [vmem:[%s4319_s12 + $0x30] sm:$0xff]   ;;  %v3530_v18 = vld [vmem:[%s4319_s12 + $0x28] sm:$0xff]  }
 0x390   : > { %3236 = vmatprep.subr.bf16.mxu0 %v3500_v56  ;;  %v3531_v56 = vld [vmem:[%s4319_s12 + $0x20] sm:$0xff]  }
 0x391   : > { %3151 = vmatmul.mubr.msk.bf16.vlgmr.msra.gmra.mxu1 %vm2018_vm15, %v2248_v25 }
 0x392   : > { %3255 = vmatpush3.bf16.msra.mxu1 %v3503_v42  ;;  %v3532_v42 = vld [vmem:[%s4319_s12 + $0x18] sm:$0xff]  }
 0x393   : > { %3237 = vmatpush3.bf16.msra.mxu0 %v3502_v2  ;;  %3256 = vmatprep.subr.bf16.mxu1 %v3505_v8  ;;  %v3533_v2 = vld [vmem:[%s4319_s12 + $0x10] sm:$0xff]   ;;  %v3534_v8 = vld [vmem:[%s4319_s12 + $0x8] sm:$0xff]  }
 0x394   : > { %3238 = vmatprep.subr.bf16.mxu0 %v3504_v50  ;;  %v3535_v50 = vld [vmem:[%s4319_s12] sm:$0xff]  }
 0x396   : > { %3257 = vmatpush3.bf16.msra.mxu1 %v3507_v10 }
 0x397   : > { %3239 = vmatpush3.bf16.msra.mxu0 %v3506_v12  ;;  %3258 = vmatprep.subr.bf16.mxu1 %v3509_v7 }
 0x398   : > { %3240 = vmatprep.subr.bf16.mxu0 %v3508_v20 }
 0x39a   : > { %3259 = vmatpush3.bf16.msra.mxu1 %v3511_v44 }
 0x39b   : > { %3241 = vmatpush3.bf16.msra.mxu0 %v3510_v45  ;;  %3260 = vmatprep.subr.bf16.mxu1 %v3513_v19 }
 0x39c   : > { %3242 = vmatprep.subr.bf16.mxu0 %v3512_v5 }
 0x39e   : > { %3261 = vmatpush3.bf16.msra.mxu1 %v3515_v51 }
 0x39f   : > { %3243 = vmatpush3.bf16.msra.mxu0 %v3514_v29  ;;  %3262 = vmatprep.subr.bf16.mxu1 %v3517_v21 }
 0x3a0   : > { %3244 = vmatprep.subr.bf16.mxu0 %v3516_v41 }
 0x3a2   : > { %3263 = vmatpush3.bf16.msra.mxu1 %v3519_v22 }
 0x3a3   : > { %3245 = vmatpush3.bf16.msra.mxu0 %v3518_v27  ;;  %3264 = vmatprep.subr.bf16.mxu1 %v3521_v26 }
 0x3a4   : > { %3246 = vmatprep.subr.bf16.mxu0 %v3520_v3 }
 0x3a6   : > { %3265 = vmatpush3.bf16.msra.mxu1 %v3523_v53 }
 0x3a7   : > { %3247 = vmatpush3.bf16.msra.mxu0 %v3522_v60  ;;  %3266 = vmatprep.subr.bf16.mxu1 %v3524_v52 }
 0x3a8   : > { %3363 = vmatprep.subr.bf16.mxu0 %v4354_v4 }
 0x3aa   : > { %3267 = vmatpush3.bf16.msra.mxu1 %v3525_v59 }
 0x3ab   : > { %3268 = vmatprep.subr.bf16.mxu1 %v3526_v30 }
 0x3ae   : > { %3269 = vmatpush3.bf16.msra.mxu1 %v3527_v58 }
 0x449   : > { %v2309_v55 = vpop.f32.mrf.mxu1  ;;  %v2432_v33 = vpop.f32.mrf.mxu0 }
 0x44a   : > { %v2310_v11 = vadd.f32 %v3138_v28, %v2309_v55  ;;  %v2433_v6 = vadd.f32 %v2432_v33, %v2341_v31 }
 0x44b   : > { %v3361_v0 = vpop.f32.mrf.mxu1  ;;  %v2434_v1 = vpop.f32.mrf.mxu0 }
 0x44c   : > { %v2435_v36 = vadd.f32 %v2434_v1, %v2345_v24  ;;  %v2316_v54 = vsel %vm2315_vm2, %v2310_v11, -inf  ;;  %v2480_v23 = vmax.f32 %v2433_v6, 0.0 }
 0x44d   : > { %v2436_v62 = vpop.f32.mrf.mxu0  ;;  %2317 = vmax.xlane.f32.xlu0 %v2316_v54  ;;  %v2312_v9 = vpop.f32.mrf.mxu1 }
 0x44e   : > { %v2481_v32 = vmax.f32 %v2435_v36, 0.0  ;;  %v2484_v13 = vpack.c.bf16 %v2480_v23, %v2480_v23 }
 0x44f   : > { %v3362_v35 = vpop.f32.mrf.mxu1  ;;  %v2437_v57 = vpop.f32.mrf.mxu0 }
 0x450   : > { %v2485_v38 = vpack.c.bf16 %v2481_v32, %v2481_v32 }
 0x451   : > { %v2473_v17 = vpop.f32.mrf.mxu1 }
 0x452   : > { %v2474_v48 = vadd.f32 %v2473_v17, %v2349_v49  ;;  %2783 = vmatprep.mubr.bf16.mxu0 %v2485_v38 }
 0x453   : > { %v2475_v25 = vpop.f32.mrf.mxu1  ;;  %2784 = vmatmul.mubr.bf16.vlgmr.msra.gmra.mxu0 %v2484_v13 }
 0x454   : > { %v2476_v15 = vadd.f32 %v2475_v25, %v2353_v39  ;;  %3379 = vmatprep.mubr.msk.bf16.mxu0 %vm3579_vm14, %v4354_v4  ;;  %v2482_v40 = vmax.f32 %v2474_v48, 0.0  ;;  %3364 = vmatpush3.bf16.msra.mxu0 %v3528_v63 }
 0x455   : > { %v2477_v47 = vpop.f32.mrf.mxu1  ;;  %3365 = vmatprep.subr.bf16.mxu0 %v4354_v4 }
 0x456   : > { %v2483_v61 = vmax.f32 %v2476_v15, 0.0  ;;  %v2486_v46 = vpack.c.bf16 %v2482_v40, %v2482_v40 }
 0x457   : > { %v2478_v16 = vpop.f32.mrf.mxu1 }
 0x458   : > { %v2487_v34 = vpack.c.bf16 %v2483_v61, %v2483_v61  ;;  %3366 = vmatpush3.bf16.msra.mxu0 %v3529_v43 }
 0x459   : > { %3367 = vmatprep.subr.bf16.mxu0 %v4354_v4 }
 0x45a   : > { %2823 = vmatprep.mubr.bf16.mxu1 %v2487_v34 }
 0x45b   : > { %2824 = vmatmul.mubr.bf16.vlgmr.msra.gmra.mxu1 %v2486_v46 }
 0x45c   : > { %3368 = vmatpush3.bf16.msra.mxu0 %v3530_v18 }
 0x45d   : > { %3369 = vmatprep.subr.bf16.mxu0 %v4354_v4 }
 0x460   : > { %3370 = vmatpush3.bf16.msra.mxu0 %v3531_v56 }
 0x461   : > { %3371 = vmatprep.subr.bf16.mxu0 %v4354_v4 }
 0x464   : > { %3372 = vmatpush3.bf16.msra.mxu0 %v3532_v42 }
 0x465   : > { %3373 = vmatprep.subr.bf16.mxu0 %v4354_v4 }
 0x468   : > { %3374 = vmatpush3.bf16.msra.mxu0 %v3533_v2 }
 0x469   : > { %3375 = vmatprep.subr.bf16.mxu0 %v4354_v4 }
 0x46c   : > { %3376 = vmatpush3.bf16.msra.mxu0 %v3534_v8 }
 0x46d   : > { %3377 = vmatprep.subr.bf16.mxu0 %v4354_v4  ;;  %v3152_v4 = vld [vmem:[%s4318_s11] ss:$0 sm:$0xff] }
 0x470   : > { %3378 = vmatpush3.bf16.msra.mxu0 %v3535_v50 }
 0x4d6   : > { %v2318_v10 = vpop.xlane.xlu0 %2317 }
 0x4d7   : > { %v2319_v12 = vsub.f32 %v2310_v11, %v2318_v10 }
 0x4d9   : > { %v2320_v7 = vmul.f32 1.442695, %v2319_v12 }
 0x4db   : > { %3548 = vpow2.f32 %v2320_v7 }
 0x4e8   : > { %v3549_v20 = vpop.eup %3548 }
 0x4e9   : > { %v2322_v44 = vsel %vm2315_vm2, %v3549_v20, 0.0 }
 0x4ea   : > { %2323 = vadd.xlane.f32.xlu1 %v2322_v44 }
 0x513   : > { %v3248_v45 = vpop.f32.mrf.mxu0 }
 0x515   : > { %v3249_v19 = vpop.f32.mrf.mxu0 }
 0x516   : > { %v3250_v29 = vadd.f32 %v3249_v19, %v3248_v45 }
 0x517   : > { %v3251_v5 = vpop.f32.mrf.mxu0 }
 0x518   : > { %v2786_v27 = vadd.f32 %v3250_v29, %v3152_v4 }
 0x519   : > { %v3252_v51 = vpop.f32.mrf.mxu0 }
 0x51b   : > { %v3270_v41 = vpop.f32.mrf.mxu1 }
 0x51d   : > { %v3271_v21 = vpop.f32.mrf.mxu1 }
 0x51e   : > { %v3272_v22 = vadd.f32 %v3271_v21, %v3270_v41 }
 0x51f   : > { %v3273_v3 = vpop.f32.mrf.mxu1 }
 0x520   : > { %v2826_v26 = vadd.f32 %v3272_v22, %v2786_v27 }
 0x521   : > { %v3274_v60 = vpop.f32.mrf.mxu1 }
 0x522   : > { %v2831_v53 = vmax.f32 %v2826_v26, 0.0 }
 0x524   : > { %v2832_v52 = vpack.c.bf16 %v2831_v53, %v2831_v53 }
 0x526   : > { %3380 = vmatmul.mubr.bf16.vlgmr.msra.gmra.mxu0 %v2832_v52 }
 0x573   : > { %v2324_v59 = vpop.xlane.xlu1 %2323 }
 0x574   : > { %3550 = vrcp.f32 %v2324_v59 }
 0x581   : > { %v3551_v30 = vpop.eup %3550 }
 0x582   : > { %v2326_v58 = vmul.f32 %v3551_v30, %v3549_v20 }
 0x584   : > { %2327 = vst [vmem:[%s503_s30] sm:$0x1f] %v2326_v58 }
 0x5e6   : > { %v2938_v31 = vpop.f32.mrf.mxu0 }
 0x5e7   : > { %v2939_v28 = vadd.f32 %v3185_v37, %v2938_v31 }
 0x5e8   : > { %v3381_v24 = vpop.f32.mrf.mxu0 }
 0x5e9   : > { %2944 = vst [vmem:[%s499_s22] sm:$0x1f] %v2939_v28 }
 0x5ea   : > { %v2941_v55 = vpop.f32.mrf.mxu0 }
 0x5ec   : > { %v3382_v33 = vpop.f32.mrf.mxu0 }
 0x5ed PF: > { %s26_s18 = sadd.s32 1, %s3558_s18  }
 0x5ee   : > { %p23_p4 = scmp.ge.s32.totalorder %s26_s18, 4  }
 0x5f0   :  { %25 = sbr.rel (!%p23_p4) target bundleno = 1 (0x1), region = 126 }

</bundles_post_ra>
